<compile_context>
chip_gen: v7x
topology: tpu7x:2x2x1
jax: 0.10.0
libtpu: 0.0.40
codegen_flags: <defaults>
</compile_context>

<pallas_src>
import math

import jax
import jax.numpy as jnp
from jax.experimental import pallas as pl
from jax.experimental.pallas import tpu as pltpu

HIDDEN = 64      # GPLayer internal hidden_dim (fixed in the PyTorch module)
LANE = 128
BATCH_GRAN = 16  # batch-tile granularity (bf16-friendly sublane packing)


def _round_up(n, m):
    return ((n + m - 1) // m) * m


# ---------------- parameter construction (matches torch init) ----------------

def _xavier_normal(key, fan_in, fan_out, gain):
    std = gain * math.sqrt(2.0 / (fan_in + fan_out))
    # stored as (in, out): same distribution as torch's (out, in) xavier init.
    return std * jax.random.normal(key, (fan_in, fan_out), dtype=jnp.float32)


def make_gp_layer_params(key, input_dim, output_dim):
    ks = jax.random.split(key, 5)
    p = {}
    # mean network: gain=0.5, bias=0
    p["w1m"] = _xavier_normal(ks[0], input_dim, HIDDEN, 0.5)
    p["b1m"] = jnp.zeros((HIDDEN,), jnp.float32)
    p["w2m"] = _xavier_normal(ks[1], HIDDEN, HIDDEN, 0.5)
    p["b2m"] = jnp.zeros((HIDDEN,), jnp.float32)
    p["w3m"] = _xavier_normal(ks[2], HIDDEN, output_dim, 0.5)
    p["b3m"] = jnp.zeros((output_dim,), jnp.float32)
    # log_var network (kept for module parity; unused by DeepGP.forward output)
    p["w1v"] = _xavier_normal(ks[3], input_dim, HIDDEN, 0.1)
    p["b1v"] = jnp.full((HIDDEN,), -2.0, jnp.float32)
    p["w2v"] = _xavier_normal(ks[4], HIDDEN, output_dim, 0.1)
    p["b2v"] = jnp.full((output_dim,), -2.0, jnp.float32)
    return p


def make_deep_gp_params(key, input_dim, hidden_dims, output_dim):
    dims = [input_dim] + list(hidden_dims) + [output_dim]
    keys = jax.random.split(key, len(dims) - 1)
    return [make_gp_layer_params(k, dims[i], dims[i + 1])
            for i, k in enumerate(keys)]


# ---------------- kernel-ready packed parameters ----------------

def prepare_fused_params(layer_params, compute_dtype=jnp.bfloat16):
    """Pad each matmul to its own tight lane-multiple shape, stack across
    layers where shapes agree, and precompute the (constant) KL term in f32."""
    L = len(layer_params)
    dims = [lp["w1m"].shape[0] for lp in layer_params]
    dims.append(layer_params[-1]["w3m"].shape[1])
    in_dim, out_dim = dims[0], dims[-1]
    mid_dims = dims[1:-1]                      # inter-layer activation widths

    H = _round_up(HIDDEN, LANE)                # 128
    D_in = _round_up(in_dim, LANE)
    D_out = _round_up(out_dim, LANE)
    D_mid = _round_up(max(mid_dims), LANE) if mid_dims else LANE

    def pad2(w, r, c):
        return jnp.pad(w, ((0, r - w.shape[0]),
                           (0, c - w.shape[1]))).astype(compute_dtype)

    def padb(b, c):
        return jnp.pad(b, (0, c - b.shape[0])).reshape(1, c).astype(jnp.float32)

    w1_first = pad2(layer_params[0]["w1m"], D_in, H)           # (D_in, H)
    w3_last = pad2(layer_params[-1]["w3m"], H, D_out)          # (H, D_out)
    b3_last = padb(layer_params[-1]["b3m"], D_out)             # (1, D_out)

    if L > 1:
        w1_rest = jnp.stack([pad2(lp["w1m"], D_mid, H)
                             for lp in layer_params[1:]])      # (L-1, D_mid, H)
        w3_rest = jnp.stack([pad2(lp["w3m"], H, D_mid)
                             for lp in layer_params[:-1]])     # (L-1, H, D_mid)
        b3_rest = jnp.stack([padb(lp["b3m"], D_mid)
                             for lp in layer_params[:-1]])     # (L-1, 1, D_mid)
    else:                                                      # keep shapes non-empty
        w1_rest = jnp.zeros((1, D_mid, H), compute_dtype)
        w3_rest = jnp.zeros((1, H, D_mid), compute_dtype)
        b3_rest = jnp.zeros((1, 1, D_mid), jnp.float32)

    w2 = jnp.stack([pad2(lp["w2m"], H, H) for lp in layer_params])   # (L, H, H)
    b1 = jnp.stack([padb(lp["b1m"], H) for lp in layer_params])      # (L, 1, H)
    b2 = jnp.stack([padb(lp["b2m"], H) for lp in layer_params])      # (L, 1, H)

    # KL is a pure function of the mean-network weights -> hoisted out of the
    # kernel, computed once in f32.
    kl = sum(0.5 * (jnp.sum(lp["w1m"] ** 2) + jnp.sum(lp["b1m"] ** 2)
                    + jnp.sum(lp["w2m"] ** 2) + jnp.sum(lp["b2m"] ** 2)
                    + jnp.sum(lp["w3m"] ** 2) + jnp.sum(lp["b3m"] ** 2))
             for lp in layer_params)
    kl_div = jnp.float32(0.001) * kl

    return dict(w1_first=w1_first, w1_rest=w1_rest, w2=w2,
                w3_rest=w3_rest, w3_last=w3_last,
                b1=b1, b2=b2, b3_rest=b3_rest, b3_last=b3_last,
                kl_div=kl_div, in_dim=in_dim, out_dim=out_dim)


# ---------------- fused Pallas kernel ----------------

def _fused_deep_gp_kernel(x_ref, w1f_ref, w1r_ref, w2_ref, w3r_ref, w3l_ref,
                          b1_ref, b2_ref, b3r_ref, b3l_ref, out_ref):
    n_layers = w2_ref.shape[0]
    cdt = w2_ref.dtype                       # bf16 matmul operands
    h = x_ref[...]                           # bf16 (TB, D_in)
    a = None
    for l in range(n_layers):                # tiny static loop -> unrolled
        w1 = w1f_ref[...] if l == 0 else w1r_ref[l - 1]
        a = jnp.dot(h, w1, preferred_element_type=jnp.float32) + b1_ref[l]
        h = jnp.tanh(a).astype(cdt)          # (TB, H) bf16
        a = jnp.dot(h, w2_ref[l], preferred_element_type=jnp.float32) + b2_ref[l]
        h = jnp.tanh(a).astype(cdt)          # (TB, H) bf16
        if l < n_layers - 1:
            a = jnp.dot(h, w3r_ref[l],
                        preferred_element_type=jnp.float32) + b3r_ref[l]
            h = a.astype(cdt)                # carry inter-layer activation in bf16
        else:
            a = jnp.dot(h, w3l_ref[...],
                        preferred_element_type=jnp.float32) + b3l_ref[...]
    out_ref[...] = a                         # f32, lane-dense (TB, D_out) store


# ---------------- wrapper ----------------

def _choose_batch_tiling(B, gran=BATCH_GRAN, max_tb=512):
    """Pick (TB, B_pad): TB a multiple of `gran`, minimizing padded-row waste,
    and keeping the batch grid >= 2 when possible (v7x megacore)."""
    Bg = _round_up(B, gran)
    cap = min(max_tb, Bg)
    if Bg >= 2 * gran:
        cap = min(cap, max(gran, (Bg // 2) // gran * gran))
    best_tb, best_pad = gran, _round_up(B, gran)
    for tb in range(gran, cap + 1, gran):
        pad = _round_up(B, tb)
        if pad < best_pad or (pad == best_pad and tb > best_tb):
            best_tb, best_pad = tb, pad
    return best_tb, best_pad


def _run_pallas(x_pad, fused, TB, single_buffer_weights):
    B_pad, D_in = x_pad.shape
    L, H, _ = fused["w2"].shape
    Lr, D_mid, _ = fused["w1_rest"].shape
    D_out = fused["w3_last"].shape[1]

    pm = {"pipeline_mode": pl.Buffered(1)} if single_buffer_weights else {}

    def resident(shape):
        return pl.BlockSpec(shape, lambda *_: (0,) * len(shape), **pm)

    in_specs = [
        pl.BlockSpec((TB, D_in), lambda i: (i, 0)),   # x tile (double-buffered)
        resident((D_in, H)),                          # w1 of layer 0
        resident((Lr, D_mid, H)),                     # w1 of layers 1..L-1
        resident((L, H, H)),                          # w2 of all layers
        resident((Lr, H, D_mid)),                     # w3 of layers 0..L-2
        resident((H, D_out)),                         # w3 of last layer
        resident((L, 1, H)),                          # b1
        resident((L, 1, H)),                          # b2
        resident((Lr, 1, D_mid)),                     # b3 of layers 0..L-2
        resident((1, D_out)),                         # b3 of last layer
    ]

    # Explicit VMEM budget: resident weights/biases (+io, + headroom for f32
    # intermediates).  v5e's default scoped limit is only 16 MiB.
    wbuf = 1 if single_buffer_weights else 2
    weight_bytes = 2 * (D_in * H + Lr * D_mid * H + L * H * H
                        + Lr * H * D_mid + H * D_out)
    bias_bytes = 4 * (2 * L * H + Lr * D_mid + D_out)
    io_bytes = 2 * (TB * D_in * 2 + TB * D_out * 4)     # double-buffered in/out
    act_bytes = 6 * TB * max(H, D_mid, D_out) * 4       # f32 intermediates headroom
    vmem_limit = int(min(max(wbuf * (weight_bytes + bias_bytes)
                             + io_bytes + act_bytes + (8 << 20),
                             32 << 20),
                         100 << 20))

    return pl.pallas_call(
        _fused_deep_gp_kernel,
        out_shape=jax.ShapeDtypeStruct((B_pad, D_out), jnp.float32),
        grid_spec=pltpu.PrefetchScalarGridSpec(
            num_scalar_prefetch=0,
            grid=(B_pad // TB,),
            in_specs=in_specs,
            out_specs=pl.BlockSpec((TB, D_out), lambda i: (i, 0)),
        ),
        compiler_params=pltpu.CompilerParams(
            dimension_semantics=("parallel",),
            vmem_limit_bytes=vmem_limit),
    )(x_pad, fused["w1_first"], fused["w1_rest"], fused["w2"],
      fused["w3_rest"], fused["w3_last"], fused["b1"], fused["b2"],
      fused["b3_rest"], fused["b3_last"])


def deep_gp_forward(x, fused):
    """DeepGP.forward (eval mode): returns (final_mean, kl_div)."""
    B, in_dim = x.shape
    assert in_dim == fused["in_dim"], "input feature dim mismatch"
    D_in = fused["w1_first"].shape[0]

    TB, B_pad = _choose_batch_tiling(B)

    # bf16 streaming + fusable jnp.pad (no extra materialized scatter pass).
    x_pad = jnp.pad(x.astype(jnp.bfloat16),
                    ((0, B_pad - B), (0, D_in - in_dim)))

    try:
        out_pad = _run_pallas(x_pad, fused, TB, single_buffer_weights=True)
    except Exception:
        # pipeline_mode=pl.Buffered(1) not supported by this jax build/backend;
        # fall back to default (double-buffered) resident weights.
        out_pad = _run_pallas(x_pad, fused, TB, single_buffer_weights=False)

    mean = out_pad[:B, :fused["out_dim"]]
    return mean, fused["kl_div"]


# ---------------- pure-JAX reference (same bf16-operand math) ----------------

def _ref_forward(x, layer_params):
    kl_div = jnp.float32(0.0)
    cur = x.astype(jnp.bfloat16)
    out_f32 = None
    for p in layer_params:
        w1 = p["w1m"].astype(jnp.bfloat16)
        w2 = p["w2m"].astype(jnp.bfloat16)
        w3 = p["w3m"].astype(jnp.bfloat16)
        h = jnp.tanh(jnp.dot(cur, w1, preferred_element_type=jnp.float32)
                     + p["b1m"]).astype(jnp.bfloat16)
        h = jnp.tanh(jnp.dot(h, w2, preferred_element_type=jnp.float32)
                     + p["b2m"]).astype(jnp.bfloat16)
        out_f32 = jnp.dot(h, w3, preferred_element_type=jnp.float32) + p["b3m"]
        cur = out_f32.astype(jnp.bfloat16)
        kl = 0.5 * sum(jnp.sum(p[k] ** 2)
                       for k in ("w1m", "b1m", "w2m", "b2m", "w3m", "b3m"))
        kl_div = kl_div + 0.001 * kl
    return out_f32, kl_div


if __name__ == "__main__":
    key = jax.random.PRNGKey(0)
    k_params, k_x = jax.random.split(key)

    batch = 8
    input_dim, hidden_dims, output_dim = 8, [16, 12], 4

    layer_params = make_deep_gp_params(k_params, input_dim, hidden_dims,
                                       output_dim)
    fused = prepare_fused_params(layer_params)
    x = jax.random.normal(k_x, (batch, input_dim), dtype=jnp.float32)

    out, kl = deep_gp_forward(x, fused)
    out = jax.block_until_ready(out)
    kl = jax.block_until_ready(kl)

    ref_out, ref_kl = _ref_forward(x, layer_params)
    assert out.shape == (batch, output_dim), "shape mismatch"
    assert jnp.allclose(out, ref_out, atol=1e-3, rtol=1e-3), "mean mismatch"
    assert jnp.allclose(kl, ref_kl, atol=1e-5, rtol=1e-5), "kl mismatch"

    print("KERNEL_OK")
</pallas_src>

<mosaic_0001>
module attributes {stable_mosaic.version = 11 : i64} {
  func.func @_fused_deep_gp_kernel(%arg0: i32, %arg1: memref<16x128xbf16, #tpu.memory_space<vmem>>, %arg2: memref<128x128xbf16, #tpu.memory_space<vmem>>, %arg3: memref<2x128x128xbf16, #tpu.memory_space<vmem>>, %arg4: memref<3x128x128xbf16, #tpu.memory_space<vmem>>, %arg5: memref<2x128x128xbf16, #tpu.memory_space<vmem>>, %arg6: memref<128x128xbf16, #tpu.memory_space<vmem>>, %arg7: memref<3x1x128xf32, #tpu.memory_space<vmem>>, %arg8: memref<3x1x128xf32, #tpu.memory_space<vmem>>, %arg9: memref<2x1x128xf32, #tpu.memory_space<vmem>>, %arg10: memref<1x128xf32, #tpu.memory_space<vmem>>, %arg11: memref<16x128xf32, #tpu.memory_space<vmem>>) attributes {dimension_semantics = [#tpu.dimension_semantics<parallel>], iteration_bounds = array<i64: 1>, scalar_prefetch = 0 : i64, scratch_operands = 0 : i64, tpu.core_type = #tpu.core_type<tc>, window_params = [{transform_indices = @transform_0, window_bounds = array<i64: 16, 128>}, {pipeline_mode = #tpu.pipeline_mode<synchronous>, transform_indices = @transform_1, window_bounds = array<i64: 128, 128>}, {pipeline_mode = #tpu.pipeline_mode<synchronous>, transform_indices = @transform_2, window_bounds = array<i64: 2, 128, 128>}, {pipeline_mode = #tpu.pipeline_mode<synchronous>, transform_indices = @transform_3, window_bounds = array<i64: 3, 128, 128>}, {pipeline_mode = #tpu.pipeline_mode<synchronous>, transform_indices = @transform_4, window_bounds = array<i64: 2, 128, 128>}, {pipeline_mode = #tpu.pipeline_mode<synchronous>, transform_indices = @transform_5, window_bounds = array<i64: 128, 128>}, {pipeline_mode = #tpu.pipeline_mode<synchronous>, transform_indices = @transform_6, window_bounds = array<i64: 3, 1, 128>}, {pipeline_mode = #tpu.pipeline_mode<synchronous>, transform_indices = @transform_7, window_bounds = array<i64: 3, 1, 128>}, {pipeline_mode = #tpu.pipeline_mode<synchronous>, transform_indices = @transform_8, window_bounds = array<i64: 2, 1, 128>}, {pipeline_mode = #tpu.pipeline_mode<synchronous>, transform_indices = @transform_9, window_bounds = array<i64: 1, 128>}, {transform_indices = @transform_10, window_bounds = array<i64: 16, 128>}]} {
    %c0 = arith.constant 0 : index
    %c0_0 = arith.constant 0 : index
    %0 = vector.load %arg1[%c0, %c0_0] : memref<16x128xbf16, #tpu.memory_space<vmem>>, vector<16x128xbf16>
    %c0_1 = arith.constant 0 : index
    %c0_2 = arith.constant 0 : index
    %1 = vector.load %arg2[%c0_1, %c0_2] : memref<128x128xbf16, #tpu.memory_space<vmem>>, vector<128x128xbf16>
    %cst = arith.constant dense<0.000000e+00> : vector<16x128xf32>
    %2 = tpu.matmul %0, %1, %cst {dimension_numbers = #tpu.dot_dimension_numbers<[1], [0], [0], [1], [0, 0, 1, 1], [], []>} : vector<16x128xbf16>, vector<128x128xbf16>, vector<16x128xf32> -> vector<16x128xf32>
    %c0_3 = arith.constant 0 : index
    %c0_4 = arith.constant 0 : index
    %c0_5 = arith.constant 0 : index
    %3 = vector.load %arg7[%c0_3, %c0_4, %c0_5] : memref<3x1x128xf32, #tpu.memory_space<vmem>>, vector<1x1x128xf32>
    %4 = vector.shape_cast %3 : vector<1x1x128xf32> to vector<1x128xf32>
    %5 = vector.broadcast %4 : vector<1x128xf32> to vector<16x128xf32>
    %6 = arith.addf %2, %5 : vector<16x128xf32>
    %7 = math.tanh %6 : vector<16x128xf32>
    %8 = arith.truncf %7 : vector<16x128xf32> to vector<16x128xbf16>
    %c0_6 = arith.constant 0 : index
    %c0_7 = arith.constant 0 : index
    %c0_8 = arith.constant 0 : index
    %9 = vector.load %arg4[%c0_6, %c0_7, %c0_8] : memref<3x128x128xbf16, #tpu.memory_space<vmem>>, vector<1x128x128xbf16>
    %10 = vector.shape_cast %9 : vector<1x128x128xbf16> to vector<128x128xbf16>
    %cst_9 = arith.constant dense<0.000000e+00> : vector<16x128xf32>
    %11 = tpu.matmul %8, %10, %cst_9 {dimension_numbers = #tpu.dot_dimension_numbers<[1], [0], [0], [1], [0, 0, 1, 1], [], []>} : vector<16x128xbf16>, vector<128x128xbf16>, vector<16x128xf32> -> vector<16x128xf32>
    %c0_10 = arith.constant 0 : index
    %c0_11 = arith.constant 0 : index
    %c0_12 = arith.constant 0 : index
    %12 = vector.load %arg8[%c0_10, %c0_11, %c0_12] : memref<3x1x128xf32, #tpu.memory_space<vmem>>, vector<1x1x128xf32>
    %13 = vector.shape_cast %12 : vector<1x1x128xf32> to vector<1x128xf32>
    %14 = vector.broadcast %13 : vector<1x128xf32> to vector<16x128xf32>
    %15 = arith.addf %11, %14 : vector<16x128xf32>
    %16 = math.tanh %15 : vector<16x128xf32>
    %17 = arith.truncf %16 : vector<16x128xf32> to vector<16x128xbf16>
    %c0_13 = arith.constant 0 : index
    %c0_14 = arith.constant 0 : index
    %c0_15 = arith.constant 0 : index
    %18 = vector.load %arg5[%c0_13, %c0_14, %c0_15] : memref<2x128x128xbf16, #tpu.memory_space<vmem>>, vector<1x128x128xbf16>
    %19 = vector.shape_cast %18 : vector<1x128x128xbf16> to vector<128x128xbf16>
    %cst_16 = arith.constant dense<0.000000e+00> : vector<16x128xf32>
    %20 = tpu.matmul %17, %19, %cst_16 {dimension_numbers = #tpu.dot_dimension_numbers<[1], [0], [0], [1], [0, 0, 1, 1], [], []>} : vector<16x128xbf16>, vector<128x128xbf16>, vector<16x128xf32> -> vector<16x128xf32>
    %c0_17 = arith.constant 0 : index
    %c0_18 = arith.constant 0 : index
    %c0_19 = arith.constant 0 : index
    %21 = vector.load %arg9[%c0_17, %c0_18, %c0_19] : memref<2x1x128xf32, #tpu.memory_space<vmem>>, vector<1x1x128xf32>
    %22 = vector.shape_cast %21 : vector<1x1x128xf32> to vector<1x128xf32>
    %23 = vector.broadcast %22 : vector<1x128xf32> to vector<16x128xf32>
    %24 = arith.addf %20, %23 : vector<16x128xf32>
    %25 = arith.truncf %24 : vector<16x128xf32> to vector<16x128xbf16>
    %c0_20 = arith.constant 0 : index
    %c0_21 = arith.constant 0 : index
    %c0_22 = arith.constant 0 : index
    %26 = vector.load %arg3[%c0_20, %c0_21, %c0_22] : memref<2x128x128xbf16, #tpu.memory_space<vmem>>, vector<1x128x128xbf16>
    %27 = vector.shape_cast %26 : vector<1x128x128xbf16> to vector<128x128xbf16>
    %cst_23 = arith.constant dense<0.000000e+00> : vector<16x128xf32>
    %28 = tpu.matmul %25, %27, %cst_23 {dimension_numbers = #tpu.dot_dimension_numbers<[1], [0], [0], [1], [0, 0, 1, 1], [], []>} : vector<16x128xbf16>, vector<128x128xbf16>, vector<16x128xf32> -> vector<16x128xf32>
    %c1 = arith.constant 1 : index
    %c0_24 = arith.constant 0 : index
    %c0_25 = arith.constant 0 : index
    %29 = vector.load %arg7[%c1, %c0_24, %c0_25] : memref<3x1x128xf32, #tpu.memory_space<vmem>>, vector<1x1x128xf32>
    %30 = vector.shape_cast %29 : vector<1x1x128xf32> to vector<1x128xf32>
    %31 = vector.broadcast %30 : vector<1x128xf32> to vector<16x128xf32>
    %32 = arith.addf %28, %31 : vector<16x128xf32>
    %33 = math.tanh %32 : vector<16x128xf32>
    %34 = arith.truncf %33 : vector<16x128xf32> to vector<16x128xbf16>
    %c1_26 = arith.constant 1 : index
    %c0_27 = arith.constant 0 : index
    %c0_28 = arith.constant 0 : index
    %35 = vector.load %arg4[%c1_26, %c0_27, %c0_28] : memref<3x128x128xbf16, #tpu.memory_space<vmem>>, vector<1x128x128xbf16>
    %36 = vector.shape_cast %35 : vector<1x128x128xbf16> to vector<128x128xbf16>
    %cst_29 = arith.constant dense<0.000000e+00> : vector<16x128xf32>
    %37 = tpu.matmul %34, %36, %cst_29 {dimension_numbers = #tpu.dot_dimension_numbers<[1], [0], [0], [1], [0, 0, 1, 1], [], []>} : vector<16x128xbf16>, vector<128x128xbf16>, vector<16x128xf32> -> vector<16x128xf32>
    %c1_30 = arith.constant 1 : index
    %c0_31 = arith.constant 0 : index
    %c0_32 = arith.constant 0 : index
    %38 = vector.load %arg8[%c1_30, %c0_31, %c0_32] : memref<3x1x128xf32, #tpu.memory_space<vmem>>, vector<1x1x128xf32>
    %39 = vector.shape_cast %38 : vector<1x1x128xf32> to vector<1x128xf32>
    %40 = vector.broadcast %39 : vector<1x128xf32> to vector<16x128xf32>
    %41 = arith.addf %37, %40 : vector<16x128xf32>
    %42 = math.tanh %41 : vector<16x128xf32>
    %43 = arith.truncf %42 : vector<16x128xf32> to vector<16x128xbf16>
    %c1_33 = arith.constant 1 : index
    %c0_34 = arith.constant 0 : index
    %c0_35 = arith.constant 0 : index
    %44 = vector.load %arg5[%c1_33, %c0_34, %c0_35] : memref<2x128x128xbf16, #tpu.memory_space<vmem>>, vector<1x128x128xbf16>
    %45 = vector.shape_cast %44 : vector<1x128x128xbf16> to vector<128x128xbf16>
    %cst_36 = arith.constant dense<0.000000e+00> : vector<16x128xf32>
    %46 = tpu.matmul %43, %45, %cst_36 {dimension_numbers = #tpu.dot_dimension_numbers<[1], [0], [0], [1], [0, 0, 1, 1], [], []>} : vector<16x128xbf16>, vector<128x128xbf16>, vector<16x128xf32> -> vector<16x128xf32>
    %c1_37 = arith.constant 1 : index
    %c0_38 = arith.constant 0 : index
    %c0_39 = arith.constant 0 : index
    %47 = vector.load %arg9[%c1_37, %c0_38, %c0_39] : memref<2x1x128xf32, #tpu.memory_space<vmem>>, vector<1x1x128xf32>
    %48 = vector.shape_cast %47 : vector<1x1x128xf32> to vector<1x128xf32>
    %49 = vector.broadcast %48 : vector<1x128xf32> to vector<16x128xf32>
    %50 = arith.addf %46, %49 : vector<16x128xf32>
    %51 = arith.truncf %50 : vector<16x128xf32> to vector<16x128xbf16>
    %c1_40 = arith.constant 1 : index
    %c0_41 = arith.constant 0 : index
    %c0_42 = arith.constant 0 : index
    %52 = vector.load %arg3[%c1_40, %c0_41, %c0_42] : memref<2x128x128xbf16, #tpu.memory_space<vmem>>, vector<1x128x128xbf16>
    %53 = vector.shape_cast %52 : vector<1x128x128xbf16> to vector<128x128xbf16>
    %cst_43 = arith.constant dense<0.000000e+00> : vector<16x128xf32>
    %54 = tpu.matmul %51, %53, %cst_43 {dimension_numbers = #tpu.dot_dimension_numbers<[1], [0], [0], [1], [0, 0, 1, 1], [], []>} : vector<16x128xbf16>, vector<128x128xbf16>, vector<16x128xf32> -> vector<16x128xf32>
    %c2 = arith.constant 2 : index
    %c0_44 = arith.constant 0 : index
    %c0_45 = arith.constant 0 : index
    %55 = vector.load %arg7[%c2, %c0_44, %c0_45] : memref<3x1x128xf32, #tpu.memory_space<vmem>>, vector<1x1x128xf32>
    %56 = vector.shape_cast %55 : vector<1x1x128xf32> to vector<1x128xf32>
    %57 = vector.broadcast %56 : vector<1x128xf32> to vector<16x128xf32>
    %58 = arith.addf %54, %57 : vector<16x128xf32>
    %59 = math.tanh %58 : vector<16x128xf32>
    %60 = arith.truncf %59 : vector<16x128xf32> to vector<16x128xbf16>
    %c2_46 = arith.constant 2 : index
    %c0_47 = arith.constant 0 : index
    %c0_48 = arith.constant 0 : index
    %61 = vector.load %arg4[%c2_46, %c0_47, %c0_48] : memref<3x128x128xbf16, #tpu.memory_space<vmem>>, vector<1x128x128xbf16>
    %62 = vector.shape_cast %61 : vector<1x128x128xbf16> to vector<128x128xbf16>
    %cst_49 = arith.constant dense<0.000000e+00> : vector<16x128xf32>
    %63 = tpu.matmul %60, %62, %cst_49 {dimension_numbers = #tpu.dot_dimension_numbers<[1], [0], [0], [1], [0, 0, 1, 1], [], []>} : vector<16x128xbf16>, vector<128x128xbf16>, vector<16x128xf32> -> vector<16x128xf32>
    %c2_50 = arith.constant 2 : index
    %c0_51 = arith.constant 0 : index
    %c0_52 = arith.constant 0 : index
    %64 = vector.load %arg8[%c2_50, %c0_51, %c0_52] : memref<3x1x128xf32, #tpu.memory_space<vmem>>, vector<1x1x128xf32>
    %65 = vector.shape_cast %64 : vector<1x1x128xf32> to vector<1x128xf32>
    %66 = vector.broadcast %65 : vector<1x128xf32> to vector<16x128xf32>
    %67 = arith.addf %63, %66 : vector<16x128xf32>
    %68 = math.tanh %67 : vector<16x128xf32>
    %69 = arith.truncf %68 : vector<16x128xf32> to vector<16x128xbf16>
    %c0_53 = arith.constant 0 : index
    %c0_54 = arith.constant 0 : index
    %70 = vector.load %arg6[%c0_53, %c0_54] : memref<128x128xbf16, #tpu.memory_space<vmem>>, vector<128x128xbf16>
    %cst_55 = arith.constant dense<0.000000e+00> : vector<16x128xf32>
    %71 = tpu.matmul %69, %70, %cst_55 {dimension_numbers = #tpu.dot_dimension_numbers<[1], [0], [0], [1], [0, 0, 1, 1], [], []>} : vector<16x128xbf16>, vector<128x128xbf16>, vector<16x128xf32> -> vector<16x128xf32>
    %c0_56 = arith.constant 0 : index
    %c0_57 = arith.constant 0 : index
    %72 = vector.load %arg10[%c0_56, %c0_57] : memref<1x128xf32, #tpu.memory_space<vmem>>, vector<1x128xf32>
    %73 = vector.broadcast %72 : vector<1x128xf32> to vector<16x128xf32>
    %74 = arith.addf %71, %73 : vector<16x128xf32>
    %c0_58 = arith.constant 0 : index
    %c0_59 = arith.constant 0 : index
    %75 = vector.load %arg11[%c0_58, %c0_59] : memref<16x128xf32, #tpu.memory_space<vmem>>, vector<16x128xf32>
    tpu.vector_store %arg11[%c0_58, %c0_59], %74 {strides = array<i32>} : memref<16x128xf32, #tpu.memory_space<vmem>>, vector<16x128xf32>,
    return
  }
  func.func @transform_0(%arg0: i32) -> (i32, i32) {
    %c0_i32 = arith.constant 0 : i32
    %c0_i32_0 = arith.constant 0 : i32
    return %arg0, %c0_i32 : i32, i32
  }
  func.func @transform_1(%arg0: i32) -> (i32, i32) {
    %c0_i32 = arith.constant 0 : i32
    %c0_i32_0 = arith.constant 0 : i32
    %c0_i32_1 = arith.constant 0 : i32
    return %c0_i32, %c0_i32_0 : i32, i32
  }
  func.func @transform_2(%arg0: i32) -> (i32, i32, i32) {
    %c0_i32 = arith.constant 0 : i32
    %c0_i32_0 = arith.constant 0 : i32
    %c0_i32_1 = arith.constant 0 : i32
    %c0_i32_2 = arith.constant 0 : i32
    return %c0_i32, %c0_i32_0, %c0_i32_1 : i32, i32, i32
  }
  func.func @transform_3(%arg0: i32) -> (i32, i32, i32) {
    %c0_i32 = arith.constant 0 : i32
    %c0_i32_0 = arith.constant 0 : i32
    %c0_i32_1 = arith.constant 0 : i32
    %c0_i32_2 = arith.constant 0 : i32
    return %c0_i32, %c0_i32_0, %c0_i32_1 : i32, i32, i32
  }
  func.func @transform_4(%arg0: i32) -> (i32, i32, i32) {
    %c0_i32 = arith.constant 0 : i32
    %c0_i32_0 = arith.constant 0 : i32
    %c0_i32_1 = arith.constant 0 : i32
    %c0_i32_2 = arith.constant 0 : i32
    return %c0_i32, %c0_i32_0, %c0_i32_1 : i32, i32, i32
  }
  func.func @transform_5(%arg0: i32) -> (i32, i32) {
    %c0_i32 = arith.constant 0 : i32
    %c0_i32_0 = arith.constant 0 : i32
    %c0_i32_1 = arith.constant 0 : i32
    return %c0_i32, %c0_i32_0 : i32, i32
  }
  func.func @transform_6(%arg0: i32) -> (i32, i32, i32) {
    %c0_i32 = arith.constant 0 : i32
    %c0_i32_0 = arith.constant 0 : i32
    %c0_i32_1 = arith.constant 0 : i32
    %c0_i32_2 = arith.constant 0 : i32
    return %c0_i32, %c0_i32_0, %c0_i32_1 : i32, i32, i32
  }
  func.func @transform_7(%arg0: i32) -> (i32, i32, i32) {
    %c0_i32 = arith.constant 0 : i32
    %c0_i32_0 = arith.constant 0 : i32
    %c0_i32_1 = arith.constant 0 : i32
    %c0_i32_2 = arith.constant 0 : i32
    return %c0_i32, %c0_i32_0, %c0_i32_1 : i32, i32, i32
  }
  func.func @transform_8(%arg0: i32) -> (i32, i32, i32) {
    %c0_i32 = arith.constant 0 : i32
    %c0_i32_0 = arith.constant 0 : i32
    %c0_i32_1 = arith.constant 0 : i32
    %c0_i32_2 = arith.constant 0 : i32
    return %c0_i32, %c0_i32_0, %c0_i32_1 : i32, i32, i32
  }
  func.func @transform_9(%arg0: i32) -> (i32, i32) {
    %c0_i32 = arith.constant 0 : i32
    %c0_i32_0 = arith.constant 0 : i32
    %c0_i32_1 = arith.constant 0 : i32
    return %c0_i32, %c0_i32_0 : i32, i32
  }
  func.func @transform_10(%arg0: i32) -> (i32, i32) {
    %c0_i32 = arith.constant 0 : i32
    %c0_i32_0 = arith.constant 0 : i32
    return %arg0, %c0_i32 : i32, i32
  }
}

module attributes {stable_mosaic.version = 11 : i64} {
  func.func @_fused_deep_gp_kernel(%arg0: i32, %arg1: memref<16x128xbf16, #tpu.memory_space<vmem>>, %arg2: memref<128x128xbf16, #tpu.memory_space<vmem>>, %arg3: memref<2x128x128xbf16, #tpu.memory_space<vmem>>, %arg4: memref<3x128x128xbf16, #tpu.memory_space<vmem>>, %arg5: memref<2x128x128xbf16, #tpu.memory_space<vmem>>, %arg6: memref<128x128xbf16, #tpu.memory_space<vmem>>, %arg7: memref<3x1x128xf32, #tpu.memory_space<vmem>>, %arg8: memref<3x1x128xf32, #tpu.memory_space<vmem>>, %arg9: memref<2x1x128xf32, #tpu.memory_space<vmem>>, %arg10: memref<1x128xf32, #tpu.memory_space<vmem>>, %arg11: memref<16x128xf32, #tpu.memory_space<vmem>>) attributes {dimension_semantics = [#tpu.dimension_semantics<parallel>], iteration_bounds = array<i64: 1>, scalar_prefetch = 0 : i64, scratch_operands = 0 : i64, tpu.core_type = #tpu.core_type<tc>, window_params = [{transform_indices = @transform_0, window_bounds = array<i64: 16, 128>}, {pipeline_mode = #tpu.pipeline_mode<synchronous>, transform_indices = @transform_1, window_bounds = array<i64: 128, 128>}, {pipeline_mode = #tpu.pipeline_mode<synchronous>, transform_indices = @transform_2, window_bounds = array<i64: 2, 128, 128>}, {pipeline_mode = #tpu.pipeline_mode<synchronous>, transform_indices = @transform_3, window_bounds = array<i64: 3, 128, 128>}, {pipeline_mode = #tpu.pipeline_mode<synchronous>, transform_indices = @transform_4, window_bounds = array<i64: 2, 128, 128>}, {pipeline_mode = #tpu.pipeline_mode<synchronous>, transform_indices = @transform_5, window_bounds = array<i64: 128, 128>}, {pipeline_mode = #tpu.pipeline_mode<synchronous>, transform_indices = @transform_6, window_bounds = array<i64: 3, 1, 128>}, {pipeline_mode = #tpu.pipeline_mode<synchronous>, transform_indices = @transform_7, window_bounds = array<i64: 3, 1, 128>}, {pipeline_mode = #tpu.pipeline_mode<synchronous>, transform_indices = @transform_8, window_bounds = array<i64: 2, 1, 128>}, {pipeline_mode = #tpu.pipeline_mode<synchronous>, transform_indices = @transform_9, window_bounds = array<i64: 1, 128>}, {transform_indices = @transform_10, window_bounds = array<i64: 16, 128>}]} {
    %c0 = arith.constant 0 : index
    %c0_0 = arith.constant 0 : index
    %0 = vector.load %arg1[%c0, %c0_0] : memref<16x128xbf16, #tpu.memory_space<vmem>>, vector<16x128xbf16>
    %c0_1 = arith.constant 0 : index
    %c0_2 = arith.constant 0 : index
    %1 = vector.load %arg2[%c0_1, %c0_2] : memref<128x128xbf16, #tpu.memory_space<vmem>>, vector<128x128xbf16>
    %cst = arith.constant dense<0.000000e+00> : vector<16x128xf32>
    %2 = tpu.matmul %0, %1, %cst {dimension_numbers = #tpu.dot_dimension_numbers<[1], [0], [0], [1], [0, 0, 1, 1], [], []>} : vector<16x128xbf16>, vector<128x128xbf16>, vector<16x128xf32> -> vector<16x128xf32>
    %c0_3 = arith.constant 0 : index
    %c0_4 = arith.constant 0 : index
    %c0_5 = arith.constant 0 : index
    %3 = vector.load %arg7[%c0_3, %c0_4, %c0_5] : memref<3x1x128xf32, #tpu.memory_space<vmem>>, vector<1x1x128xf32>
    %4 = vector.shape_cast %3 : vector<1x1x128xf32> to vector<1x128xf32>
    %5 = vector.broadcast %4 : vector<1x128xf32> to vector<16x128xf32>
    %6 = arith.addf %2, %5 : vector<16x128xf32>
    %7 = math.tanh %6 : vector<16x128xf32>
    %8 = arith.truncf %7 : vector<16x128xf32> to vector<16x128xbf16>
    %c0_6 = arith.constant 0 : index
    %c0_7 = arith.constant 0 : index
    %c0_8 = arith.constant 0 : index
    %9 = vector.load %arg4[%c0_6, %c0_7, %c0_8] : memref<3x128x128xbf16, #tpu.memory_space<vmem>>, vector<1x128x128xbf16>
    %10 = vector.shape_cast %9 : vector<1x128x128xbf16> to vector<128x128xbf16>
    %cst_9 = arith.constant dense<0.000000e+00> : vector<16x128xf32>
    %11 = tpu.matmul %8, %10, %cst_9 {dimension_numbers = #tpu.dot_dimension_numbers<[1], [0], [0], [1], [0, 0, 1, 1], [], []>} : vector<16x128xbf16>, vector<128x128xbf16>, vector<16x128xf32> -> vector<16x128xf32>
    %c0_10 = arith.constant 0 : index
    %c0_11 = arith.constant 0 : index
    %c0_12 = arith.constant 0 : index
    %12 = vector.load %arg8[%c0_10, %c0_11, %c0_12] : memref<3x1x128xf32, #tpu.memory_space<vmem>>, vector<1x1x128xf32>
    %13 = vector.shape_cast %12 : vector<1x1x128xf32> to vector<1x128xf32>
    %14 = vector.broadcast %13 : vector<1x128xf32> to vector<16x128xf32>
    %15 = arith.addf %11, %14 : vector<16x128xf32>
    %16 = math.tanh %15 : vector<16x128xf32>
    %17 = arith.truncf %16 : vector<16x128xf32> to vector<16x128xbf16>
    %c0_13 = arith.constant 0 : index
    %c0_14 = arith.constant 0 : index
    %c0_15 = arith.constant 0 : index
    %18 = vector.load %arg5[%c0_13, %c0_14, %c0_15] : memref<2x128x128xbf16, #tpu.memory_space<vmem>>, vector<1x128x128xbf16>
    %19 = vector.shape_cast %18 : vector<1x128x128xbf16> to vector<128x128xbf16>
    %cst_16 = arith.constant dense<0.000000e+00> : vector<16x128xf32>
    %20 = tpu.matmul %17, %19, %cst_16 {dimension_numbers = #tpu.dot_dimension_numbers<[1], [0], [0], [1], [0, 0, 1, 1], [], []>} : vector<16x128xbf16>, vector<128x128xbf16>, vector<16x128xf32> -> vector<16x128xf32>
    %c0_17 = arith.constant 0 : index
    %c0_18 = arith.constant 0 : index
    %c0_19 = arith.constant 0 : index
    %21 = vector.load %arg9[%c0_17, %c0_18, %c0_19] : memref<2x1x128xf32, #tpu.memory_space<vmem>>, vector<1x1x128xf32>
    %22 = vector.shape_cast %21 : vector<1x1x128xf32> to vector<1x128xf32>
    %23 = vector.broadcast %22 : vector<1x128xf32> to vector<16x128xf32>
    %24 = arith.addf %20, %23 : vector<16x128xf32>
    %25 = arith.truncf %24 : vector<16x128xf32> to vector<16x128xbf16>
    %c0_20 = arith.constant 0 : index
    %c0_21 = arith.constant 0 : index
    %c0_22 = arith.constant 0 : index
    %26 = vector.load %arg3[%c0_20, %c0_21, %c0_22] : memref<2x128x128xbf16, #tpu.memory_space<vmem>>, vector<1x128x128xbf16>
    %27 = vector.shape_cast %26 : vector<1x128x128xbf16> to vector<128x128xbf16>
    %cst_23 = arith.constant dense<0.000000e+00> : vector<16x128xf32>
    %28 = tpu.matmul %25, %27, %cst_23 {dimension_numbers = #tpu.dot_dimension_numbers<[1], [0], [0], [1], [0, 0, 1, 1], [], []>} : vector<16x128xbf16>, vector<128x128xbf16>, vector<16x128xf32> -> vector<16x128xf32>
    %c1 = arith.constant 1 : index
    %c0_24 = arith.constant 0 : index
    %c0_25 = arith.constant 0 : index
    %29 = vector.load %arg7[%c1, %c0_24, %c0_25] : memref<3x1x128xf32, #tpu.memory_space<vmem>>, vector<1x1x128xf32>
    %30 = vector.shape_cast %29 : vector<1x1x128xf32> to vector<1x128xf32>
    %31 = vector.broadcast %30 : vector<1x128xf32> to vector<16x128xf32>
    %32 = arith.addf %28, %31 : vector<16x128xf32>
    %33 = math.tanh %32 : vector<16x128xf32>
    %34 = arith.truncf %33 : vector<16x128xf32> to vector<16x128xbf16>
    %c1_26 = arith.constant 1 : index
    %c0_27 = arith.constant 0 : index
    %c0_28 = arith.constant 0 : index
    %35 = vector.load %arg4[%c1_26, %c0_27, %c0_28] : memref<3x128x128xbf16, #tpu.memory_space<vmem>>, vector<1x128x128xbf16>
    %36 = vector.shape_cast %35 : vector<1x128x128xbf16> to vector<128x128xbf16>
    %cst_29 = arith.constant dense<0.000000e+00> : vector<16x128xf32>
    %37 = tpu.matmul %34, %36, %cst_29 {dimension_numbers = #tpu.dot_dimension_numbers<[1], [0], [0], [1], [0, 0, 1, 1], [], []>} : vector<16x128xbf16>, vector<128x128xbf16>, vector<16x128xf32> -> vector<16x128xf32>
    %c1_30 = arith.constant 1 : index
    %c0_31 = arith.constant 0 : index
    %c0_32 = arith.constant 0 : index
    %38 = vector.load %arg8[%c1_30, %c0_31, %c0_32] : memref<3x1x128xf32, #tpu.memory_space<vmem>>, vector<1x1x128xf32>
    %39 = vector.shape_cast %38 : vector<1x1x128xf32> to vector<1x128xf32>
    %40 = vector.broadcast %39 : vector<1x128xf32> to vector<16x128xf32>
    %41 = arith.addf %37, %40 : vector<16x128xf32>
    %42 = math.tanh %41 : vector<16x128xf32>
    %43 = arith.truncf %42 : vector<16x128xf32> to vector<16x128xbf16>
    %c1_33 = arith.constant 1 : index
    %c0_34 = arith.constant 0 : index
    %c0_35 = arith.constant 0 : index
    %44 = vector.load %arg5[%c1_33, %c0_34, %c0_35] : memref<2x128x128xbf16, #tpu.memory_space<vmem>>, vector<1x128x128xbf16>
    %45 = vector.shape_cast %44 : vector<1x128x128xbf16> to vector<128x128xbf16>
    %cst_36 = arith.constant dense<0.000000e+00> : vector<16x128xf32>
    %46 = tpu.matmul %43, %45, %cst_36 {dimension_numbers = #tpu.dot_dimension_numbers<[1], [0], [0], [1], [0, 0, 1, 1], [], []>} : vector<16x128xbf16>, vector<128x128xbf16>, vector<16x128xf32> -> vector<16x128xf32>
    %c1_37 = arith.constant 1 : index
    %c0_38 = arith.constant 0 : index
    %c0_39 = arith.constant 0 : index
    %47 = vector.load %arg9[%c1_37, %c0_38, %c0_39] : memref<2x1x128xf32, #tpu.memory_space<vmem>>, vector<1x1x128xf32>
    %48 = vector.shape_cast %47 : vector<1x1x128xf32> to vector<1x128xf32>
    %49 = vector.broadcast %48 : vector<1x128xf32> to vector<16x128xf32>
    %50 = arith.addf %46, %49 : vector<16x128xf32>
    %51 = arith.truncf %50 : vector<16x128xf32> to vector<16x128xbf16>
    %c1_40 = arith.constant 1 : index
    %c0_41 = arith.constant 0 : index
    %c0_42 = arith.constant 0 : index
    %52 = vector.load %arg3[%c1_40, %c0_41, %c0_42] : memref<2x128x128xbf16, #tpu.memory_space<vmem>>, vector<1x128x128xbf16>
    %53 = vector.shape_cast %52 : vector<1x128x128xbf16> to vector<128x128xbf16>
    %cst_43 = arith.constant dense<0.000000e+00> : vector<16x128xf32>
    %54 = tpu.matmul %51, %53, %cst_43 {dimension_numbers = #tpu.dot_dimension_numbers<[1], [0], [0], [1], [0, 0, 1, 1], [], []>} : vector<16x128xbf16>, vector<128x128xbf16>, vector<16x128xf32> -> vector<16x128xf32>
    %c2 = arith.constant 2 : index
    %c0_44 = arith.constant 0 : index
    %c0_45 = arith.constant 0 : index
    %55 = vector.load %arg7[%c2, %c0_44, %c0_45] : memref<3x1x128xf32, #tpu.memory_space<vmem>>, vector<1x1x128xf32>
    %56 = vector.shape_cast %55 : vector<1x1x128xf32> to vector<1x128xf32>
    %57 = vector.broadcast %56 : vector<1x128xf32> to vector<16x128xf32>
    %58 = arith.addf %54, %57 : vector<16x128xf32>
    %59 = math.tanh %58 : vector<16x128xf32>
    %60 = arith.truncf %59 : vector<16x128xf32> to vector<16x128xbf16>
    %c2_46 = arith.constant 2 : index
    %c0_47 = arith.constant 0 : index
    %c0_48 = arith.constant 0 : index
    %61 = vector.load %arg4[%c2_46, %c0_47, %c0_48] : memref<3x128x128xbf16, #tpu.memory_space<vmem>>, vector<1x128x128xbf16>
    %62 = vector.shape_cast %61 : vector<1x128x128xbf16> to vector<128x128xbf16>
    %cst_49 = arith.constant dense<0.000000e+00> : vector<16x128xf32>
    %63 = tpu.matmul %60, %62, %cst_49 {dimension_numbers = #tpu.dot_dimension_numbers<[1], [0], [0], [1], [0, 0, 1, 1], [], []>} : vector<16x128xbf16>, vector<128x128xbf16>, vector<16x128xf32> -> vector<16x128xf32>
    %c2_50 = arith.constant 2 : index
    %c0_51 = arith.constant 0 : index
    %c0_52 = arith.constant 0 : index
    %64 = vector.load %arg8[%c2_50, %c0_51, %c0_52] : memref<3x1x128xf32, #tpu.memory_space<vmem>>, vector<1x1x128xf32>
    %65 = vector.shape_cast %64 : vector<1x1x128xf32> to vector<1x128xf32>
    %66 = vector.broadcast %65 : vector<1x128xf32> to vector<16x128xf32>
    %67 = arith.addf %63, %66 : vector<16x128xf32>
    %68 = math.tanh %67 : vector<16x128xf32>
    %69 = arith.truncf %68 : vector<16x128xf32> to vector<16x128xbf16>
    %c0_53 = arith.constant 0 : index
    %c0_54 = arith.constant 0 : index
    %70 = vector.load %arg6[%c0_53, %c0_54] : memref<128x128xbf16, #tpu.memory_space<vmem>>, vector<128x128xbf16>
    %cst_55 = arith.constant dense<0.000000e+00> : vector<16x128xf32>
    %71 = tpu.matmul %69, %70, %cst_55 {dimension_numbers = #tpu.dot_dimension_numbers<[1], [0], [0], [1], [0, 0, 1, 1], [], []>} : vector<16x128xbf16>, vector<128x128xbf16>, vector<16x128xf32> -> vector<16x128xf32>
    %c0_56 = arith.constant 0 : index
    %c0_57 = arith.constant 0 : index
    %72 = vector.load %arg10[%c0_56, %c0_57] : memref<1x128xf32, #tpu.memory_space<vmem>>, vector<1x128xf32>
    %73 = vector.broadcast %72 : vector<1x128xf32> to vector<16x128xf32>
    %74 = arith.addf %71, %73 : vector<16x128xf32>
    %c0_58 = arith.constant 0 : index
    %c0_59 = arith.constant 0 : index
    %75 = vector.load %arg11[%c0_58, %c0_59] : memref<16x128xf32, #tpu.memory_space<vmem>>, vector<16x128xf32>
    tpu.vector_store %arg11[%c0_58, %c0_59], %74 {strides = array<i32>} : memref<16x128xf32, #tpu.memory_space<vmem>>, vector<16x128xf32>,
    return
  }
  func.func @transform_0(%arg0: i32) -> (i32, i32) {
    %c0_i32 = arith.constant 0 : i32
    %c0_i32_0 = arith.constant 0 : i32
    return %arg0, %c0_i32 : i32, i32
  }
  func.func @transform_1(%arg0: i32) -> (i32, i32) {
    %c0_i32 = arith.constant 0 : i32
    %c0_i32_0 = arith.constant 0 : i32
    %c0_i32_1 = arith.constant 0 : i32
    return %c0_i32, %c0_i32_0 : i32, i32
  }
  func.func @transform_2(%arg0: i32) -> (i32, i32, i32) {
    %c0_i32 = arith.constant 0 : i32
    %c0_i32_0 = arith.constant 0 : i32
    %c0_i32_1 = arith.constant 0 : i32
    %c0_i32_2 = arith.constant 0 : i32
    return %c0_i32, %c0_i32_0, %c0_i32_1 : i32, i32, i32
  }
  func.func @transform_3(%arg0: i32) -> (i32, i32, i32) {
    %c0_i32 = arith.constant 0 : i32
    %c0_i32_0 = arith.constant 0 : i32
    %c0_i32_1 = arith.constant 0 : i32
    %c0_i32_2 = arith.constant 0 : i32
    return %c0_i32, %c0_i32_0, %c0_i32_1 : i32, i32, i32
  }
  func.func @transform_4(%arg0: i32) -> (i32, i32, i32) {
    %c0_i32 = arith.constant 0 : i32
    %c0_i32_0 = arith.constant 0 : i32
    %c0_i32_1 = arith.constant 0 : i32
    %c0_i32_2 = arith.constant 0 : i32
    return %c0_i32, %c0_i32_0, %c0_i32_1 : i32, i32, i32
  }
  func.func @transform_5(%arg0: i32) -> (i32, i32) {
    %c0_i32 = arith.constant 0 : i32
    %c0_i32_0 = arith.constant 0 : i32
    %c0_i32_1 = arith.constant 0 : i32
    return %c0_i32, %c0_i32_0 : i32, i32
  }
  func.func @transform_6(%arg0: i32) -> (i32, i32, i32) {
    %c0_i32 = arith.constant 0 : i32
    %c0_i32_0 = arith.constant 0 : i32
    %c0_i32_1 = arith.constant 0 : i32
    %c0_i32_2 = arith.constant 0 : i32
    return %c0_i32, %c0_i32_0, %c0_i32_1 : i32, i32, i32
  }
  func.func @transform_7(%arg0: i32) -> (i32, i32, i32) {
    %c0_i32 = arith.constant 0 : i32
    %c0_i32_0 = arith.constant 0 : i32
    %c0_i32_1 = arith.constant 0 : i32
    %c0_i32_2 = arith.constant 0 : i32
    return %c0_i32, %c0_i32_0, %c0_i32_1 : i32, i32, i32
  }
  func.func @transform_8(%arg0: i32) -> (i32, i32, i32) {
    %c0_i32 = arith.constant 0 : i32
    %c0_i32_0 = arith.constant 0 : i32
    %c0_i32_1 = arith.constant 0 : i32
    %c0_i32_2 = arith.constant 0 : i32
    return %c0_i32, %c0_i32_0, %c0_i32_1 : i32, i32, i32
  }
  func.func @transform_9(%arg0: i32) -> (i32, i32) {
    %c0_i32 = arith.constant 0 : i32
    %c0_i32_0 = arith.constant 0 : i32
    %c0_i32_1 = arith.constant 0 : i32
    return %c0_i32, %c0_i32_0 : i32, i32
  }
  func.func @transform_10(%arg0: i32) -> (i32, i32) {
    %c0_i32 = arith.constant 0 : i32
    %c0_i32_0 = arith.constant 0 : i32
    return %arg0, %c0_i32 : i32, i32
  }
}

</mosaic_0001>

<bundles_post_ra>
// kernel: tpu_custom_call.1
= control target key start
LH: loop header
LB: loop body
LE: loop exit
PB: predicated region body
PF: predicated region fallthrough
CT: control target
= control target key end

     0   :  { %15 = vsyncpa [#allocation3], 0  ;;  %s2116_s0 = inlined_call_operand.hbm [shape: bf16[16,128], index: 0, kind: input, shape index: {}]   ;;  %s2117_s1 = inlined_call_operand.hbm [shape: bf16[128,128], index: 1, kind: input, shape index: {}]   ;;  %s2118_s2 = inlined_call_operand.hbm [shape: bf16[2,128,128], index: 2, kind: input, shape index: {}]   ;;  %s2119_s3 = inlined_call_operand.hbm [shape: bf16[3,128,128], index: 3, kind: input, shape index: {}]   ;;  %s2120_s4 = inlined_call_operand.hbm [shape: bf16[2,128,128], index: 4, kind: input, shape index: {}]   ;;  %s2121_s5 = inlined_call_operand.hbm [shape: bf16[128,128], index: 5, kind: input, shape index: {}]   ;;  %s2122_s6 = inlined_call_operand.vmem [shape: f32[3,1,128], index: 6, kind: input, shape index: {}]   ;;  %s2123_s7 = inlined_call_operand.vmem [shape: f32[3,1,128], index: 7, kind: input, shape index: {}]   ;;  %s2124_s8 = inlined_call_operand.vmem [shape: f32[2,1,128], index: 8, kind: input, shape index: {}]   ;;  %s2125_s9 = inlined_call_operand.vmem [shape: f32[1,128], index: 9, kind: input, shape index: {}]   ;;  %s2126_s10 = inlined_call_operand.hbm [shape: f32[16,128], index: 10, kind: output, shape index: {}]  }
   0x1   :  { %16 = vsyncpa [#allocation6], 0 }
   0x2   :  { %17 = vsyncpa [#allocation9], 0 }
   0x3   :  { %18 = vsyncpa [#allocation12], 0 }
   0x4   :  { %19 = vsyncpa [#allocation4], 0  ;;  %s1808_s13 = smov [#allocation5]   ;;  %s1809_s15 = smov [#allocation8]  }
   0x5   :  { %s37_s14 = sshll.u32 %s1808_s13, 4  ;;  %s61_s16 = sshll.u32 %s1809_s15, 4  ;;  %s38_s14 = int_to_ptr.vmem [resolvable:$true] %s37_s14  ;;  %s1876_s16 = int_to_ptr.vmem [resolvable:$true] %s61_s16 }
   0x6   :  { %s1644_s19 = scalar_lea.hbm %s2117_s1, 1024 }
   0x7   :  { %p1645_p0 = scmp.ne.s32.totalorder %s2117_s1, %s1644_s19  ;;  %p1648_p1 = scmp.lt.u32.totalorder %s1644_s19, %s2117_s1 }
   0x9   :  { %p1650_p2 = pnand %p1648_p1, %p1645_p0 }
   0xb   :  { %1653 = shalt.err (!%p1650_p2)
}
   0xc   :  { %s1654_s24 = scalar_lea.vmem %s38_s14, 1024  ;;  %p1659_p4 = scmp.lt.s32.totalorder %s38_s14, %s38_s14 }
   0xd   :  { %p1655_p3 = scmp.ne.s32.totalorder %s38_s14, %s1654_s24  ;;  %p1660_p5 = scmp.lt.s32.totalorder %s1654_s24, %s1654_s24 }
   0xf   :  { %p1661_p6 = por %p1660_p5, %p1659_p4 }
  0x11   :  { %p1662_p7 = pnand %p1661_p6, %p1655_p3 }
  0x13   :  { %1665 = shalt.err (!%p1662_p7)
}
  0x14   :  { %s1810_s25 = smov 64   ;;  %s1811_s26 = smov 4  }
  0x15   :  { %43 = dma.hbm_to_vmem [thread:$0]  %s2117_s1, 1024, %s38_s14, [#allocation6], %s1810_s25, %s1810_s25, %s1811_s26  }
  0x16   :  { %s1666_s11 = scalar_lea.hbm %s2119_s3, 3072 }
  0x17   :  { %p1667_p8 = scmp.ne.s32.totalorder %s2119_s3, %s1666_s11  ;;  %p1670_p9 = scmp.lt.u32.totalorder %s1666_s11, %s2119_s3 }
  0x19   :  { %p1672_p10 = pnand %p1670_p9, %p1667_p8 }
  0x1b   :  { %1675 = shalt.err (!%p1672_p10)
}
  0x1c   :  { %s1676_s18 = scalar_lea.vmem %s1876_s16, 3072  ;;  %p1681_p12 = scmp.lt.s32.totalorder %s1876_s16, %s1876_s16 }
  0x1d   :  { %p1677_p11 = scmp.ne.s32.totalorder %s1876_s16, %s1676_s18  ;;  %p1682_p13 = scmp.lt.s32.totalorder %s1676_s18, %s1676_s18 }
  0x1f   :  { %p1683_p0 = por %p1682_p13, %p1681_p12 }
  0x21   :  { %p1684_p1 = pnand %p1683_p0, %p1677_p11 }
  0x23   :  { %1687 = shalt.err (!%p1684_p1)
}
  0x24   :  { %67 = dma.hbm_to_vmem [thread:$0]  %s2119_s3, 3072, %s1876_s16, [#allocation9], %s1810_s25, %s1810_s25, %s1811_s26  }
  0x25   :  { %s1812_s19 = smov [#allocation2]   ;;  %s1813_s21 = smov [#allocation7]  }
  0x26   :  { %s25_s20 = sshll.u32 %s1812_s19, 4  ;;  %s49_s22 = sshll.u32 %s1813_s21, 4  ;;  %s26_s20 = int_to_ptr.vmem [resolvable:$true] %s25_s20  ;;  %s1913_s22 = int_to_ptr.vmem [resolvable:$true] %s49_s22 }
  0x27   :  { %s1688_s27 = scalar_lea.hbm %s2116_s0, 128 }
  0x28   :  { %p1689_p2 = scmp.ne.s32.totalorder %s2116_s0, %s1688_s27  ;;  %p1692_p3 = scmp.lt.u32.totalorder %s1688_s27, %s2116_s0 }
  0x2a   :  { %p1694_p4 = pnand %p1692_p3, %p1689_p2 }
  0x2c   :  { %1697 = shalt.err (!%p1694_p4)
}
  0x2d   :  { %s1698_s3 = scalar_lea.vmem %s26_s20, 128  ;;  %p1703_p6 = scmp.lt.s32.totalorder %s26_s20, %s26_s20 }
  0x2e   :  { %p1699_p5 = scmp.ne.s32.totalorder %s26_s20, %s1698_s3  ;;  %p1704_p7 = scmp.lt.s32.totalorder %s1698_s3, %s1698_s3 }
  0x30   :  { %p1705_p8 = por %p1704_p7, %p1703_p6 }
  0x32   :  { %p1706_p9 = pnand %p1705_p8, %p1699_p5 }
  0x34   :  { %1709 = shalt.err (!%p1706_p9)
}
  0x35   :  { %31 = dma.hbm_to_vmem [thread:$0]  %s2116_s0, 128, %s26_s20, [#allocation3], %s1810_s25, %s1810_s25, %s1811_s26  }
  0x36   :  { %s1710_s17 = scalar_lea.hbm %s2118_s2, 2048 }
  0x37   :  { %p1711_p10 = scmp.ne.s32.totalorder %s2118_s2, %s1710_s17  ;;  %p1714_p11 = scmp.lt.u32.totalorder %s1710_s17, %s2118_s2 }
  0x39   :  { %p1716_p12 = pnand %p1714_p11, %p1711_p10 }
  0x3b   :  { %1719 = shalt.err (!%p1716_p12)
}
  0x3c   :  { %s1720_s21 = scalar_lea.vmem %s1913_s22, 2048  ;;  %p1725_p0 = scmp.lt.s32.totalorder %s1913_s22, %s1913_s22 }
  0x3d   :  { %p1721_p13 = scmp.ne.s32.totalorder %s1913_s22, %s1720_s21  ;;  %p1726_p1 = scmp.lt.s32.totalorder %s1720_s21, %s1720_s21 }
  0x3f   :  { %p1727_p2 = por %p1726_p1, %p1725_p0 }
  0x41   :  { %p1728_p3 = pnand %p1727_p2, %p1721_p13 }
  0x43   :  { %1731 = shalt.err (!%p1728_p3)
}
  0x44   :  { %55 = dma.hbm_to_vmem [thread:$0]  %s2118_s2, 2048, %s1913_s22, [#allocation6], %s1810_s25, %s1810_s25, %s1811_s26  }
  0x45   :  { %s1814_s23 = smov [#allocation10]   ;;  %s1815_s27 = smov [#allocation11]  }
  0x46   :  { %s73_s24 = sshll.u32 %s1814_s23, 4  ;;  %s85_s28 = sshll.u32 %s1815_s27, 4  ;;  %s74_s24 = int_to_ptr.vmem [resolvable:$true] %s73_s24  ;;  %s1950_s28 = int_to_ptr.vmem [resolvable:$true] %s85_s28 }
  0x47   :  { %s1732_s11 = scalar_lea.hbm %s2120_s4, 2048 }
  0x48   :  { %p1733_p4 = scmp.ne.s32.totalorder %s2120_s4, %s1732_s11  ;;  %p1736_p5 = scmp.lt.u32.totalorder %s1732_s11, %s2120_s4 }
  0x4a   :  { %p1738_p6 = pnand %p1736_p5, %p1733_p4 }
  0x4c   :  { %1741 = shalt.err (!%p1738_p6)
}
  0x4d   :  { %s1742_s2 = scalar_lea.vmem %s74_s24, 2048  ;;  %p1747_p8 = scmp.lt.s32.totalorder %s74_s24, %s74_s24 }
  0x4e   :  { %p1743_p7 = scmp.ne.s32.totalorder %s74_s24, %s1742_s2  ;;  %p1748_p9 = scmp.lt.s32.totalorder %s1742_s2, %s1742_s2 }
  0x50   :  { %p1749_p10 = por %p1748_p9, %p1747_p8 }
  0x52   :  { %p1750_p11 = pnand %p1749_p10, %p1743_p7 }
  0x54   :  { %1753 = shalt.err (!%p1750_p11)
}
  0x55   :  { %79 = dma.hbm_to_vmem [thread:$0]  %s2120_s4, 2048, %s74_s24, [#allocation9], %s1810_s25, %s1810_s25, %s1811_s26  }
  0x56   :  { %s1754_s1 = scalar_lea.hbm %s2121_s5, 1024 }
  0x57   :  { %p1755_p12 = scmp.ne.s32.totalorder %s2121_s5, %s1754_s1  ;;  %p1758_p13 = scmp.lt.u32.totalorder %s1754_s1, %s2121_s5 }
  0x59   :  { %p1760_p0 = pnand %p1758_p13, %p1755_p12 }
  0x5b   :  { %1763 = shalt.err (!%p1760_p0)
}
  0x5c   :  { %s1764_s20 = scalar_lea.vmem %s1950_s28, 1024  ;;  %p1769_p2 = scmp.lt.s32.totalorder %s1950_s28, %s1950_s28 }
  0x5d   :  { %p1765_p1 = scmp.ne.s32.totalorder %s1950_s28, %s1764_s20  ;;  %p1770_p3 = scmp.lt.s32.totalorder %s1764_s20, %s1764_s20 }
  0x5f   :  { %p1771_p4 = por %p1770_p3, %p1769_p2 }
  0x61   :  { %p1772_p5 = pnand %p1771_p4, %p1765_p1 }
  0x63   :  { %1775 = shalt.err (!%p1772_p5)
}
  0x64   :  { %91 = dma.hbm_to_vmem [thread:$0]  %s2121_s5, 1024, %s1950_s28, [#allocation12], %s1810_s25, %s1810_s25, %s1811_s26  }
  0x65   :  { %1798 = dma.done.wait [#allocation3], 128  }
  0x66   :  { %1799 = vsyncadd [#allocation3], 4294967168 }
  0x67   :  { %1800 = dma.done.wait [#allocation6], 3072  }
  0x68   :  { %1801 = vsyncadd [#allocation6], 4294964224 }
  0x69   :  { %1802 = dma.done.wait [#allocation9], 5120  }
  0x6a   :  { %1803 = vsyncadd [#allocation9], 4294962176 }
  0x6b   :  { %1804 = dma.done.wait [#allocation12], 1024  }
  0x6c   :  { %1805 = vsyncadd [#allocation12], 4294966272  ;;  %v1816_v0 = vmov 0.0   ;;  %vm1817_vm0 = vmmov 0   ;;  %v1547_v1 = vld [vmem:[#allocation5] sm:$0xff]   ;;  %v1548_v2 = vld [vmem:[#allocation5 + $0x8] sm:$0xff]  }
  0x6d   :  { %1354 = vmatprep.subr.bf16.mxu0 %v1816_v0  ;;  %1370 = vmatprep.mubr.msk.bf16.mxu0 %vm1817_vm0, %v1816_v0  ;;  %v1549_v3 = vld [vmem:[#allocation5 + $0x10] sm:$0xff]   ;;  %v1556_v4 = vld [vmem:[#allocation8] sm:$0xff]   ;;  %v1550_v5 = vld [vmem:[#allocation5 + $0x18] sm:$0xff]   ;;  %s1818_s17 = smov [#allocation13]  }
  0x6e   :  { %1374 = vmatprep.subr.bf16.mxu1 %v1816_v0  ;;  %1390 = vmatprep.mubr.msk.bf16.mxu1 %vm1817_vm0, %v1816_v0  ;;  %v1557_v6 = vld [vmem:[#allocation8 + $0x8] sm:$0xff]   ;;  %v1551_v7 = vld [vmem:[#allocation5 + $0x20] sm:$0xff]   ;;  %v1558_v8 = vld [vmem:[#allocation8 + $0x10] sm:$0xff]   ;;  %s1171_s18 = sshll.u32 %s1818_s17, 4  ;;  %s1172_s18 = int_to_ptr.vmem [resolvable:$true] %s1171_s18 }
  0x6f   :  { %1355 = vmatpush3.bf16.msra.mxu0 %v1547_v1  ;;  %1375 = vmatpush3.bf16.msra.mxu1 %v1556_v4  ;;  %v1552_v9 = vld [vmem:[#allocation5 + $0x28] sm:$0xff]   ;;  %v1559_v10 = vld [vmem:[#allocation8 + $0x18] sm:$0xff]   ;;  %v1553_v11 = vld [vmem:[#allocation5 + $0x30] sm:$0xff]   ;;  %p1781_p7 = scmp.lt.s32.totalorder %s1172_s18, %s1172_s18 }
  0x70   :  { %1356 = vmatprep.subr.bf16.mxu0 %v1816_v0  ;;  %1376 = vmatprep.subr.bf16.mxu1 %v1816_v0  ;;  %v1554_v12 = vld [vmem:[#allocation5 + $0x38] sm:$0xff]   ;;  %v1560_v14 = vld [vmem:[#allocation8 + $0x20] sm:$0xff]   ;;  %v1561_v15 = vld [vmem:[#allocation8 + $0x28] sm:$0xff]  }
  0x71   :  { %v1555_v13 = vld [vmem:[#allocation2] sm:$0xff]   ;;  %v1562_v16 = vld [vmem:[#allocation8 + $0x30] sm:$0xff]   ;;  %v1564_v18 = vld [vmem:[#allocation10] sm:$0xff]  }
  0x72   :  { %v1563_v17 = vld [vmem:[#allocation8 + $0x38] sm:$0xff]   ;;  %v1565_v19 = vld [vmem:[#allocation10 + $0x8] sm:$0xff]   ;;  %v1566_v20 = vld [vmem:[#allocation10 + $0x10] sm:$0xff]  }
  0x73   :  { %1357 = vmatpush3.bf16.msra.mxu0 %v1548_v2  ;;  %1377 = vmatpush3.bf16.msra.mxu1 %v1557_v6  ;;  %v1567_v21 = vld [vmem:[#allocation10 + $0x18] sm:$0xff]   ;;  %v1568_v32 = vld [vmem:[#allocation10 + $0x20] sm:$0xff]   ;;  %v1569_v33 = vld [vmem:[#allocation10 + $0x28] sm:$0xff]  }
  0x74   :  { %1358 = vmatprep.subr.bf16.mxu0 %v1816_v0  ;;  %1378 = vmatprep.subr.bf16.mxu1 %v1816_v0  ;;  %v1186_v22 = vld [vmem:[%s2122_s6] ss:$0 sm:$0xff]  ;;  %v1570_v34 = vld [vmem:[#allocation10 + $0x30] sm:$0xff]   ;;  %v1572_v36 = vld [vmem:[#allocation7] sm:$0xff]  }
  0x75   :  { %v1571_v35 = vld [vmem:[#allocation10 + $0x38] sm:$0xff]   ;;  %v1573_v37 = vld [vmem:[#allocation7 + $0x8] sm:$0xff]   ;;  %v1574_v38 = vld [vmem:[#allocation7 + $0x10] sm:$0xff]  }
  0x76   :  { %v1575_v39 = vld [vmem:[#allocation7 + $0x18] sm:$0xff]   ;;  %v1576_v40 = vld [vmem:[#allocation7 + $0x20] sm:$0xff]   ;;  %v1577_v41 = vld [vmem:[#allocation7 + $0x28] sm:$0xff]  }
  0x77   :  { %1359 = vmatpush3.bf16.msra.mxu0 %v1549_v3  ;;  %1379 = vmatpush3.bf16.msra.mxu1 %v1558_v8  ;;  %v1196_v42 = vld [vmem:[%s2123_s7] ss:$0 sm:$0xff]  ;;  %v1578_v52 = vld [vmem:[#allocation7 + $0x30] sm:$0xff]   ;;  %v1580_v54 = vld [vmem:[#allocation8 + $0x40] sm:$0xff]  }
  0x78   :  { %1360 = vmatprep.subr.bf16.mxu0 %v1816_v0  ;;  %1380 = vmatprep.subr.bf16.mxu1 %v1816_v0  ;;  %v1579_v53 = vld [vmem:[#allocation7 + $0x38] sm:$0xff]   ;;  %v1581_v55 = vld [vmem:[#allocation8 + $0x48] sm:$0xff]   ;;  %v1582_v56 = vld [vmem:[#allocation8 + $0x50] sm:$0xff]  }
  0x79   :  { %v1583_v57 = vld [vmem:[#allocation8 + $0x58] sm:$0xff]   ;;  %v1584_v3 = vld [vmem:[#allocation8 + $0x60] sm:$0xff]   ;;  %v1585_v4 = vld [vmem:[#allocation8 + $0x68] sm:$0xff]  }
  0x7a   :  { %v1205_v58 = vld [vmem:[%s2124_s8] ss:$0 sm:$0xff]  ;;  %v1589_v8 = vld [vmem:[#allocation10 + $0x48] sm:$0xff]  }
  0x7b   :  { %1361 = vmatpush3.bf16.msra.mxu0 %v1550_v5  ;;  %1381 = vmatpush3.bf16.msra.mxu1 %v1559_v10  ;;  %v1586_v5 = vld [vmem:[#allocation8 + $0x70] sm:$0xff]   ;;  %v1587_v6 = vld [vmem:[#allocation8 + $0x78] sm:$0xff]  }
  0x7c   :  { %1362 = vmatprep.subr.bf16.mxu0 %v1816_v0  ;;  %1382 = vmatprep.subr.bf16.mxu1 %v1816_v0  ;;  %v1591_v10 = vld [vmem:[#allocation10 + $0x58] sm:$0xff]  }
  0x7f   :  { %1363 = vmatpush3.bf16.msra.mxu0 %v1551_v7  ;;  %1383 = vmatpush3.bf16.msra.mxu1 %v1560_v14  ;;  %v1588_v7 = vld [vmem:[#allocation10 + $0x40] sm:$0xff]  }
  0x80   :  { %1364 = vmatprep.subr.bf16.mxu0 %v1816_v0  ;;  %1384 = vmatprep.subr.bf16.mxu1 %v1816_v0 }
  0x83   :  { %1365 = vmatpush3.bf16.msra.mxu0 %v1552_v9  ;;  %1385 = vmatpush3.bf16.msra.mxu1 %v1561_v15  ;;  %v1590_v9 = vld [vmem:[#allocation10 + $0x50] sm:$0xff]  }
  0x84   :  { %1366 = vmatprep.subr.bf16.mxu0 %v1816_v0  ;;  %1386 = vmatprep.subr.bf16.mxu1 %v1816_v0 }
  0x87   :  { %1367 = vmatpush3.bf16.msra.mxu0 %v1553_v11  ;;  %1387 = vmatpush3.bf16.msra.mxu1 %v1562_v16  ;;  %v1215_v11 = vld [vmem:[%s2122_s6 + $0x1] ss:$0 sm:$0xff] }
  0x88   :  { %1368 = vmatprep.subr.bf16.mxu0 %v1816_v0  ;;  %1388 = vmatprep.subr.bf16.mxu1 %v1816_v0 }
  0x8b   :  { %1369 = vmatpush3.bf16.msra.mxu0 %v1554_v12  ;;  %1389 = vmatpush3.bf16.msra.mxu1 %v1563_v17 }
  0x8c   :  { %1394 = vmatprep.subr.bf16.mxu0 %v1816_v0  ;;  %1414 = vmatprep.subr.bf16.mxu1 %v1816_v0 }
  0x8e   :  { %1371 = vmatmul.mubr.bf16.vlgmr.msra.gmra.mrb[0].mxu0 %v1555_v13 }
  0x8f   :  { %1410 = vmatprep.mubr.msk.bf16.mxu0 %vm1817_vm0, %v1816_v0  ;;  %1395 = vmatpush3.bf16.msra.mxu0 %v1564_v18 }
  0x90   :  { %1396 = vmatprep.subr.bf16.mxu0 %v1816_v0 }
  0x93   :  { %1397 = vmatpush3.bf16.msra.mxu0 %v1565_v19 }
  0x94   :  { %1398 = vmatprep.subr.bf16.mxu0 %v1816_v0 }
  0x97   :  { %1399 = vmatpush3.bf16.msra.mxu0 %v1566_v20 }
  0x98   :  { %1400 = vmatprep.subr.bf16.mxu0 %v1816_v0 }
  0x9b   :  { %1401 = vmatpush3.bf16.msra.mxu0 %v1567_v21  ;;  %v1592_v21 = vld [vmem:[#allocation10 + $0x60] sm:$0xff]  }
  0x9c   :  { %1402 = vmatprep.subr.bf16.mxu0 %v1816_v0 }
  0x9f   :  { %1403 = vmatpush3.bf16.msra.mxu0 %v1568_v32 }
  0xa0   :  { %1404 = vmatprep.subr.bf16.mxu0 %v1816_v0 }
  0xa3   :  { %1405 = vmatpush3.bf16.msra.mxu0 %v1569_v33 }
  0xa4   :  { %1406 = vmatprep.subr.bf16.mxu0 %v1816_v0 }
  0xa7   :  { %1407 = vmatpush3.bf16.msra.mxu0 %v1570_v34 }
  0xa8   :  { %1408 = vmatprep.subr.bf16.mxu0 %v1816_v0 }
  0xab   :  { %1409 = vmatpush3.bf16.msra.mxu0 %v1571_v35 }
  0xac   :  { %1434 = vmatprep.subr.bf16.mxu0 %v1816_v0 }
 0x161   :  { %v232_v23 = vpop.f32.mrb[0].mxu0 }
 0x162   :  { %v233_v24 = vadd.f32 %v1186_v22, %v232_v23  ;;  %v1372_v25 = vpop.f32.mrb[1].mxu0  ;;  %v1594_v23 = vld [vmem:[#allocation10 + $0x70] sm:$0xff]  }
 0x163   :  { %v235_v26 = vpop.f32.mrb[2].mxu0  ;;  %v1596_v25 = vld [vmem:[#allocation7 + $0x40] sm:$0xff]  }
 0x164   :  { %v236_v27 = vadd.f32 %v1186_v22, %v235_v26  ;;  %v1373_v28 = vpop.f32.mrb[3].mxu0  ;;  %1620 = vtanh.f32 %v233_v24  ;;  %v1593_v22 = vld [vmem:[#allocation10 + $0x68] sm:$0xff]   ;;  %v1595_v24 = vld [vmem:[#allocation10 + $0x78] sm:$0xff]  }
 0x165   :  { %v1597_v26 = vld [vmem:[#allocation7 + $0x48] sm:$0xff]   ;;  %v1599_v28 = vld [vmem:[#allocation7 + $0x58] sm:$0xff]  }
 0x166   :  { %1622 = vtanh.f32 %v236_v27  ;;  %v1598_v27 = vld [vmem:[#allocation7 + $0x50] sm:$0xff]  }
 0x16e   :  { %v1621_v29 = vpop.eup %1620 }
 0x170   :  { %v1623_v30 = vpop.eup %1622 }
 0x171   :  { %v241_v31 = vpack.c.bf16 %v1623_v30, %v1621_v29  ;;  %v1600_v29 = vld [vmem:[#allocation7 + $0x60] sm:$0xff]   ;;  %v1601_v30 = vld [vmem:[#allocation7 + $0x68] sm:$0xff]  }
 0x173   :  { %1391 = vmatmul.mubr.bf16.vlgmr.msra.gmra.mrb[0].mxu1 %v241_v31  ;;  %v1225_v31 = vld [vmem:[%s2123_s7 + $0x1] ss:$0 sm:$0xff] }
 0x174   :  { %1430 = vmatprep.mubr.msk.bf16.mxu1 %vm1817_vm0, %v1816_v0  ;;  %1415 = vmatpush3.bf16.msra.mxu1 %v1572_v36 }
 0x175   :  { %1416 = vmatprep.subr.bf16.mxu1 %v1816_v0 }
 0x178   :  { %1417 = vmatpush3.bf16.msra.mxu1 %v1573_v37 }
 0x179   :  { %1418 = vmatprep.subr.bf16.mxu1 %v1816_v0 }
 0x17c   :  { %1419 = vmatpush3.bf16.msra.mxu1 %v1574_v38 }
 0x17d   :  { %1420 = vmatprep.subr.bf16.mxu1 %v1816_v0 }
 0x180   :  { %1421 = vmatpush3.bf16.msra.mxu1 %v1575_v39 }
 0x181   :  { %1422 = vmatprep.subr.bf16.mxu1 %v1816_v0 }
 0x184   :  { %1423 = vmatpush3.bf16.msra.mxu1 %v1576_v40 }
 0x185   :  { %1424 = vmatprep.subr.bf16.mxu1 %v1816_v0 }
 0x188   :  { %1425 = vmatpush3.bf16.msra.mxu1 %v1577_v41  ;;  %v1602_v41 = vld [vmem:[#allocation7 + $0x70] sm:$0xff]  }
 0x189   :  { %1426 = vmatprep.subr.bf16.mxu1 %v1816_v0 }
 0x18c   :  { %1427 = vmatpush3.bf16.msra.mxu1 %v1578_v52 }
 0x18d   :  { %1428 = vmatprep.subr.bf16.mxu1 %v1816_v0 }
 0x190   :  { %1429 = vmatpush3.bf16.msra.mxu1 %v1579_v53 }
 0x191   :  { %1454 = vmatprep.subr.bf16.mxu1 %v1816_v0 }
 0x246   :  { %v347_v43 = vpop.f32.mrb[0].mxu1 }
 0x247   :  { %v348_v44 = vadd.f32 %v1196_v42, %v347_v43  ;;  %v1392_v45 = vpop.f32.mrb[1].mxu1  ;;  %v1604_v43 = vld [vmem:[#allocation8 + $0x80] sm:$0xff]  }
 0x248   :  { %v350_v46 = vpop.f32.mrb[2].mxu1  ;;  %v1606_v45 = vld [vmem:[#allocation8 + $0x90] sm:$0xff]  }
 0x249   :  { %v351_v47 = vadd.f32 %v1196_v42, %v350_v46  ;;  %v1393_v48 = vpop.f32.mrb[3].mxu1  ;;  %1624 = vtanh.f32 %v348_v44  ;;  %v1603_v42 = vld [vmem:[#allocation7 + $0x78] sm:$0xff]   ;;  %v1605_v44 = vld [vmem:[#allocation8 + $0x88] sm:$0xff]  }
 0x24a   :  { %v1607_v46 = vld [vmem:[#allocation8 + $0x98] sm:$0xff]  }
 0x24b   :  { %1626 = vtanh.f32 %v351_v47  ;;  %v1235_v47 = vld [vmem:[%s2124_s8 + $0x1] ss:$0 sm:$0xff] }
 0x253   :  { %v1625_v49 = vpop.eup %1624 }
 0x255   :  { %v1627_v50 = vpop.eup %1626 }
 0x256   :  { %v356_v51 = vpack.c.bf16 %v1627_v50, %v1625_v49 }
 0x258   :  { %1411 = vmatmul.mubr.bf16.vlgmr.msra.gmra.mrb[4].mxu0 %v356_v51 }
 0x259   :  { %1450 = vmatprep.mubr.msk.bf16.mxu0 %vm1817_vm0, %v1816_v0  ;;  %1435 = vmatpush3.bf16.msra.mxu0 %v1580_v54 }
 0x25a   :  { %1436 = vmatprep.subr.bf16.mxu0 %v1816_v0 }
 0x25d   :  { %1437 = vmatpush3.bf16.msra.mxu0 %v1581_v55  ;;  %v1608_v55 = vld [vmem:[#allocation8 + $0xa0] sm:$0xff]  }
 0x25e   :  { %1438 = vmatprep.subr.bf16.mxu0 %v1816_v0 }
 0x261   :  { %1439 = vmatpush3.bf16.msra.mxu0 %v1582_v56  ;;  %v1609_v56 = vld [vmem:[#allocation8 + $0xa8] sm:$0xff]  }
 0x262   :  { %1440 = vmatprep.subr.bf16.mxu0 %v1816_v0 }
 0x265   :  { %1441 = vmatpush3.bf16.msra.mxu0 %v1583_v57  ;;  %v1610_v57 = vld [vmem:[#allocation8 + $0xb0] sm:$0xff]  }
 0x266   :  { %1442 = vmatprep.subr.bf16.mxu0 %v1816_v0 }
 0x269   :  { %1443 = vmatpush3.bf16.msra.mxu0 %v1584_v3 }
 0x26a   :  { %1444 = vmatprep.subr.bf16.mxu0 %v1816_v0 }
 0x26d   :  { %1445 = vmatpush3.bf16.msra.mxu0 %v1585_v4 }
 0x26e   :  { %1446 = vmatprep.subr.bf16.mxu0 %v1816_v0 }
 0x271   :  { %1447 = vmatpush3.bf16.msra.mxu0 %v1586_v5 }
 0x272   :  { %1448 = vmatprep.subr.bf16.mxu0 %v1816_v0 }
 0x275   :  { %1449 = vmatpush3.bf16.msra.mxu0 %v1587_v6 }
 0x276   :  { %1474 = vmatprep.subr.bf16.mxu0 %v1816_v0 }
 0x32b   :  { %v462_v59 = vpop.f32.mrb[4].mxu0 }
 0x32c   :  { %v1412_v60 = vpop.f32.mrb[5].mxu0  ;;  %v463_v62 = vadd.f32 %v1205_v58, %v462_v59  ;;  %v1612_v59 = vld [vmem:[#allocation11] sm:$0xff]  }
 0x32d   :  { %v465_v61 = vpop.f32.mrb[6].mxu0  ;;  %v1613_v60 = vld [vmem:[#allocation11 + $0x8] sm:$0xff]  }
 0x32e   :  { %v466_v63 = vadd.f32 %v1205_v58, %v465_v61  ;;  %v1413_v1 = vpop.f32.mrb[7].mxu0  ;;  %v1611_v58 = vld [vmem:[#allocation8 + $0xb8] sm:$0xff]   ;;  %v1614_v61 = vld [vmem:[#allocation11 + $0x10] sm:$0xff]  }
 0x330   :  { %v469_v2 = vpack.c.bf16 %v466_v63, %v463_v62  ;;  %v1615_v62 = vld [vmem:[#allocation11 + $0x18] sm:$0xff]  }
 0x331   :  { %v1245_v63 = vld [vmem:[%s2122_s6 + $0x2] ss:$0 sm:$0xff] }
 0x332   :  { %1431 = vmatmul.mubr.bf16.vlgmr.msra.gmra.mrb[4].mxu1 %v469_v2 }
 0x333   :  { %1470 = vmatprep.mubr.msk.bf16.mxu1 %vm1817_vm0, %v1816_v0  ;;  %1455 = vmatpush3.bf16.msra.mxu1 %v1588_v7 }
 0x334   :  { %1456 = vmatprep.subr.bf16.mxu1 %v1816_v0 }
 0x337   :  { %1457 = vmatpush3.bf16.msra.mxu1 %v1589_v8 }
 0x338   :  { %1458 = vmatprep.subr.bf16.mxu1 %v1816_v0 }
 0x33b   :  { %1459 = vmatpush3.bf16.msra.mxu1 %v1590_v9 }
 0x33c   :  { %1460 = vmatprep.subr.bf16.mxu1 %v1816_v0 }
 0x33f   :  { %1461 = vmatpush3.bf16.msra.mxu1 %v1591_v10  ;;  %v1616_v10 = vld [vmem:[#allocation11 + $0x20] sm:$0xff]  }
 0x340   :  { %1462 = vmatprep.subr.bf16.mxu1 %v1816_v0 }
 0x343   :  { %1463 = vmatpush3.bf16.msra.mxu1 %v1592_v21 }
 0x344   :  { %1464 = vmatprep.subr.bf16.mxu1 %v1816_v0 }
 0x347   :  { %1465 = vmatpush3.bf16.msra.mxu1 %v1593_v22 }
 0x348   :  { %1466 = vmatprep.subr.bf16.mxu1 %v1816_v0 }
 0x34b   :  { %1467 = vmatpush3.bf16.msra.mxu1 %v1594_v23 }
 0x34c   :  { %1468 = vmatprep.subr.bf16.mxu1 %v1816_v0 }
 0x34f   :  { %1469 = vmatpush3.bf16.msra.mxu1 %v1595_v24 }
 0x350   :  { %1494 = vmatprep.subr.bf16.mxu1 %v1816_v0 }
 0x405   :  { %v576_v12 = vpop.f32.mrb[4].mxu1 }
 0x406   :  { %v577_v13 = vadd.f32 %v1215_v11, %v576_v12  ;;  %v1432_v14 = vpop.f32.mrb[5].mxu1  ;;  %v1618_v12 = vld [vmem:[#allocation11 + $0x30] sm:$0xff]  }
 0x407   :  { %v579_v15 = vpop.f32.mrb[6].mxu1  ;;  %v1255_v14 = vld [vmem:[%s2123_s7 + $0x2] ss:$0 sm:$0xff]  ;;  %s1776_s7 = scalar_lea.vmem %s1172_s18, 256 }
 0x408   :  { %v580_v16 = vadd.f32 %v1215_v11, %v579_v15  ;;  %v1433_v17 = vpop.f32.mrb[7].mxu1  ;;  %1628 = vtanh.f32 %v577_v13  ;;  %v1617_v11 = vld [vmem:[#allocation11 + $0x28] sm:$0xff]   ;;  %v1619_v13 = vld [vmem:[#allocation11 + $0x38] sm:$0xff]   ;;  %p1777_p6 = scmp.ne.s32.totalorder %s1172_s18, %s1776_s7  ;;  %p1782_p8 = scmp.lt.s32.totalorder %s1776_s7, %s1776_s7 }
 0x40a   :  { %1630 = vtanh.f32 %v580_v16  ;;  %p1783_p9 = por %p1782_p8, %p1781_p7 }
 0x40c   :  { %p1784_p10 = pnand %p1783_p9, %p1777_p6 }
 0x412   :  { %v1629_v18 = vpop.eup %1628 }
 0x414   :  { %v1631_v19 = vpop.eup %1630 }
 0x415   :  { %v585_v20 = vpack.c.bf16 %v1631_v19, %v1629_v18 }
 0x417   :  { %1451 = vmatmul.mubr.bf16.vlgmr.msra.gmra.mrb[8].mxu0 %v585_v20 }
 0x418   :  { %1490 = vmatprep.mubr.msk.bf16.mxu0 %vm1817_vm0, %v1816_v0  ;;  %1475 = vmatpush3.bf16.msra.mxu0 %v1596_v25 }
 0x419   :  { %1476 = vmatprep.subr.bf16.mxu0 %v1816_v0 }
 0x41c   :  { %1477 = vmatpush3.bf16.msra.mxu0 %v1597_v26 }
 0x41d   :  { %1478 = vmatprep.subr.bf16.mxu0 %v1816_v0 }
 0x420   :  { %1479 = vmatpush3.bf16.msra.mxu0 %v1598_v27 }
 0x421   :  { %1480 = vmatprep.subr.bf16.mxu0 %v1816_v0 }
 0x424   :  { %1481 = vmatpush3.bf16.msra.mxu0 %v1599_v28 }
 0x425   :  { %1482 = vmatprep.subr.bf16.mxu0 %v1816_v0 }
 0x428   :  { %1483 = vmatpush3.bf16.msra.mxu0 %v1600_v29 }
 0x429   :  { %1484 = vmatprep.subr.bf16.mxu0 %v1816_v0 }
 0x42c   :  { %1485 = vmatpush3.bf16.msra.mxu0 %v1601_v30 }
 0x42d   :  { %1486 = vmatprep.subr.bf16.mxu0 %v1816_v0 }
 0x430   :  { %1487 = vmatpush3.bf16.msra.mxu0 %v1602_v41 }
 0x431   :  { %1488 = vmatprep.subr.bf16.mxu0 %v1816_v0 }
 0x434   :  { %1489 = vmatpush3.bf16.msra.mxu0 %v1603_v42 }
 0x435   :  { %1514 = vmatprep.subr.bf16.mxu0 %v1816_v0 }
 0x4ea   :  { %v693_v32 = vpop.f32.mrb[8].mxu0 }
 0x4eb   :  { %v694_v33 = vadd.f32 %v1225_v31, %v693_v32  ;;  %v1452_v34 = vpop.f32.mrb[9].mxu0 }
 0x4ec   :  { %v696_v35 = vpop.f32.mrb[10].mxu0 }
 0x4ed   :  { %v697_v36 = vadd.f32 %v1225_v31, %v696_v35  ;;  %v1453_v37 = vpop.f32.mrb[11].mxu0  ;;  %1632 = vtanh.f32 %v694_v33 }
 0x4ef   :  { %1634 = vtanh.f32 %v697_v36 }
 0x4f7   :  { %v1633_v38 = vpop.eup %1632 }
 0x4f9   :  { %v1635_v39 = vpop.eup %1634 }
 0x4fa   :  { %v702_v40 = vpack.c.bf16 %v1635_v39, %v1633_v38 }
 0x4fc   :  { %1471 = vmatmul.mubr.bf16.vlgmr.msra.gmra.mrb[8].mxu1 %v702_v40 }
 0x4fd   :  { %1510 = vmatprep.mubr.msk.bf16.mxu1 %vm1817_vm0, %v1816_v0  ;;  %1495 = vmatpush3.bf16.msra.mxu1 %v1604_v43 }
 0x4fe   :  { %1496 = vmatprep.subr.bf16.mxu1 %v1816_v0 }
 0x501   :  { %1497 = vmatpush3.bf16.msra.mxu1 %v1605_v44 }
 0x502   :  { %1498 = vmatprep.subr.bf16.mxu1 %v1816_v0 }
 0x505   :  { %1499 = vmatpush3.bf16.msra.mxu1 %v1606_v45 }
 0x506   :  { %1500 = vmatprep.subr.bf16.mxu1 %v1816_v0 }
 0x509   :  { %1501 = vmatpush3.bf16.msra.mxu1 %v1607_v46 }
 0x50a   :  { %1502 = vmatprep.subr.bf16.mxu1 %v1816_v0 }
 0x50d   :  { %1503 = vmatpush3.bf16.msra.mxu1 %v1608_v55 }
 0x50e   :  { %1504 = vmatprep.subr.bf16.mxu1 %v1816_v0 }
 0x511   :  { %1505 = vmatpush3.bf16.msra.mxu1 %v1609_v56 }
 0x512   :  { %1506 = vmatprep.subr.bf16.mxu1 %v1816_v0 }
 0x515   :  { %1507 = vmatpush3.bf16.msra.mxu1 %v1610_v57 }
 0x516   :  { %1508 = vmatprep.subr.bf16.mxu1 %v1816_v0 }
 0x519   :  { %1509 = vmatpush3.bf16.msra.mxu1 %v1611_v58 }
 0x5cf   :  { %v810_v48 = vpop.f32.mrb[8].mxu1 }
 0x5d0   :  { %v1472_v49 = vpop.f32.mrb[9].mxu1  ;;  %v811_v51 = vadd.f32 %v1235_v47, %v810_v48 }
 0x5d1   :  { %v813_v50 = vpop.f32.mrb[10].mxu1 }
 0x5d2   :  { %v814_v52 = vadd.f32 %v1235_v47, %v813_v50  ;;  %v1473_v53 = vpop.f32.mrb[11].mxu1 }
 0x5d4   :  { %v817_v54 = vpack.c.bf16 %v814_v52, %v811_v51 }
 0x5d6   :  { %1491 = vmatmul.mubr.bf16.vlgmr.msra.gmra.mrb[12].mxu0 %v817_v54 }
 0x5d7   :  { %1530 = vmatprep.mubr.msk.bf16.mxu0 %vm1817_vm0, %v1816_v0  ;;  %1515 = vmatpush3.bf16.msra.mxu0 %v1612_v59 }
 0x5d8   :  { %1516 = vmatprep.subr.bf16.mxu0 %v1816_v0 }
 0x5db   :  { %1517 = vmatpush3.bf16.msra.mxu0 %v1613_v60 }
 0x5dc   :  { %1518 = vmatprep.subr.bf16.mxu0 %v1816_v0 }
 0x5df   :  { %1519 = vmatpush3.bf16.msra.mxu0 %v1614_v61 }
 0x5e0   :  { %1520 = vmatprep.subr.bf16.mxu0 %v1816_v0 }
 0x5e3   :  { %1521 = vmatpush3.bf16.msra.mxu0 %v1615_v62 }
 0x5e4   :  { %1522 = vmatprep.subr.bf16.mxu0 %v1816_v0 }
 0x5e7   :  { %1523 = vmatpush3.bf16.msra.mxu0 %v1616_v10 }
 0x5e8   :  { %1524 = vmatprep.subr.bf16.mxu0 %v1816_v0 }
 0x5eb   :  { %1525 = vmatpush3.bf16.msra.mxu0 %v1617_v11 }
 0x5ec   :  { %1526 = vmatprep.subr.bf16.mxu0 %v1816_v0 }
 0x5ef   :  { %1527 = vmatpush3.bf16.msra.mxu0 %v1618_v12 }
 0x5f0   :  { %1528 = vmatprep.subr.bf16.mxu0 %v1816_v0  ;;  %v1264_v0 = vld [vmem:[%s2125_s9] ss:$0 sm:$0xff] }
 0x5f3   :  { %1529 = vmatpush3.bf16.msra.mxu0 %v1619_v13 }
 0x6a9   :  { %v925_v1 = vpop.f32.mrb[12].mxu0 }
 0x6aa   :  { %v926_v2 = vadd.f32 %v1245_v63, %v925_v1  ;;  %v1492_v3 = vpop.f32.mrb[13].mxu0 }
 0x6ab   :  { %v928_v4 = vpop.f32.mrb[14].mxu0 }
 0x6ac   :  { %v929_v5 = vadd.f32 %v1245_v63, %v928_v4  ;;  %v1493_v6 = vpop.f32.mrb[15].mxu0  ;;  %1636 = vtanh.f32 %v926_v2 }
 0x6ae   :  { %1638 = vtanh.f32 %v929_v5 }
 0x6b6   :  { %v1637_v7 = vpop.eup %1636 }
 0x6b8   :  { %v1639_v8 = vpop.eup %1638 }
 0x6b9   :  { %v934_v9 = vpack.c.bf16 %v1639_v8, %v1637_v7 }
 0x6bb   :  { %1511 = vmatmul.mubr.bf16.vlgmr.msra.gmra.mrb[12].mxu1 %v934_v9 }
 0x78e   :  { %v1042_v15 = vpop.f32.mrb[12].mxu1 }
 0x78f   :  { %v1043_v16 = vadd.f32 %v1255_v14, %v1042_v15  ;;  %v1512_v17 = vpop.f32.mrb[13].mxu1 }
 0x790   :  { %v1045_v18 = vpop.f32.mrb[14].mxu1 }
 0x791   :  { %v1046_v19 = vadd.f32 %v1255_v14, %v1045_v18  ;;  %v1513_v20 = vpop.f32.mrb[15].mxu1  ;;  %1640 = vtanh.f32 %v1043_v16 }
 0x793   :  { %1642 = vtanh.f32 %v1046_v19 }
 0x79b   :  { %v1641_v21 = vpop.eup %1640 }
 0x79d   :  { %v1643_v22 = vpop.eup %1642 }
 0x79e   :  { %v1051_v23 = vpack.c.bf16 %v1643_v22, %v1641_v21 }
 0x7a0   :  { %1531 = vmatmul.mubr.bf16.vlgmr.msra.gmra.mrb[16].mxu0 %v1051_v23 }
 0x873   :  { %v1157_v24 = vpop.f32.mrb[16].mxu0 }
 0x874   :  { %v1158_v25 = vadd.f32 %v1264_v0, %v1157_v24  ;;  %v1532_v26 = vpop.f32.mrb[17].mxu0 }
 0x875   :  { %v1160_v27 = vpop.f32.mrb[18].mxu0 }
 0x876   :  { %1164 = vst [vmem:[#allocation13] sm:$0xff] %v1158_v25  ;;  %v1161_v28 = vadd.f32 %v1264_v0, %v1160_v27  ;;  %v1533_v29 = vpop.f32.mrb[19].mxu0 }
 0x878   :  { %1165 = vst [vmem:[#allocation13 + $0x8] sm:$0xff] %v1161_v28 }
 0x879   :  { %1787 = shalt.err (!%p1784_p10)
}
 0x87a   :  { %s1788_s14 = scalar_lea.hbm %s2126_s10, 256 }
 0x87b   :  { %p1789_p11 = scmp.ne.s32.totalorder %s2126_s10, %s1788_s14  ;;  %p1792_p12 = scmp.lt.u32.totalorder %s1788_s14, %s2126_s10 }
 0x87d   :  { %p1794_p13 = pnand %p1792_p12, %p1789_p11 }
 0x87f   :  { %1797 = shalt.err (!%p1794_p13)
}
 0x880   :  { %s1819_s4 = smov 128   ;;  %s1820_s23 = smov 8  }
 0x881   :  { %1177 = dma.vmem_to_hbm [thread:$0]  %s1172_s18, 256, %s2126_s10, [#allocation4], %s1819_s4, %s1819_s4, %s1820_s23  }
 0x882   :  { %1806 = dma.done.wait [#allocation4], 256  }
 0x883   :  { %1807 = vsyncadd [#allocation4], 4294967040 }
 0x884   :  { %1181 = vsyncpa [#allocation3], 1 }
 0x885   :  { %1182 = vsyncpa [#allocation6], 1 }
 0x886   :  { %1183 = vsyncpa [#allocation9], 1 }
 0x887   :  { %1184 = vsyncpa [#allocation12], 1 }
 0x888   :  { %1185 = vsyncpa [#allocation4], 1 }

// kernel: tpu_custom_call.1
= control target key start
LH: loop header
LB: loop body
LE: loop exit
PB: predicated region body
PF: predicated region fallthrough
CT: control target
= control target key end

     0   :  { %15 = vsyncpa [#allocation3], 0  ;;  %s2116_s0 = inlined_call_operand.hbm [shape: bf16[16,128], index: 0, kind: input, shape index: {}]   ;;  %s2117_s1 = inlined_call_operand.hbm [shape: bf16[128,128], index: 1, kind: input, shape index: {}]   ;;  %s2118_s2 = inlined_call_operand.hbm [shape: bf16[2,128,128], index: 2, kind: input, shape index: {}]   ;;  %s2119_s3 = inlined_call_operand.hbm [shape: bf16[3,128,128], index: 3, kind: input, shape index: {}]   ;;  %s2120_s4 = inlined_call_operand.hbm [shape: bf16[2,128,128], index: 4, kind: input, shape index: {}]   ;;  %s2121_s5 = inlined_call_operand.hbm [shape: bf16[128,128], index: 5, kind: input, shape index: {}]   ;;  %s2122_s6 = inlined_call_operand.vmem [shape: f32[3,1,128], index: 6, kind: input, shape index: {}]   ;;  %s2123_s7 = inlined_call_operand.vmem [shape: f32[3,1,128], index: 7, kind: input, shape index: {}]   ;;  %s2124_s8 = inlined_call_operand.vmem [shape: f32[2,1,128], index: 8, kind: input, shape index: {}]   ;;  %s2125_s9 = inlined_call_operand.vmem [shape: f32[1,128], index: 9, kind: input, shape index: {}]   ;;  %s2126_s10 = inlined_call_operand.hbm [shape: f32[16,128], index: 10, kind: output, shape index: {}]  }
   0x1   :  { %16 = vsyncpa [#allocation6], 0 }
   0x2   :  { %17 = vsyncpa [#allocation9], 0 }
   0x3   :  { %18 = vsyncpa [#allocation12], 0 }
   0x4   :  { %19 = vsyncpa [#allocation4], 0  ;;  %s1808_s13 = smov [#allocation5]   ;;  %s1809_s15 = smov [#allocation8]  }
   0x5   :  { %s37_s14 = sshll.u32 %s1808_s13, 4  ;;  %s61_s16 = sshll.u32 %s1809_s15, 4  ;;  %s38_s14 = int_to_ptr.vmem [resolvable:$true] %s37_s14  ;;  %s1876_s16 = int_to_ptr.vmem [resolvable:$true] %s61_s16 }
   0x6   :  { %s1644_s19 = scalar_lea.hbm %s2117_s1, 1024 }
   0x7   :  { %p1645_p0 = scmp.ne.s32.totalorder %s2117_s1, %s1644_s19  ;;  %p1648_p1 = scmp.lt.u32.totalorder %s1644_s19, %s2117_s1 }
   0x9   :  { %p1650_p2 = pnand %p1648_p1, %p1645_p0 }
   0xb   :  { %1653 = shalt.err (!%p1650_p2)
}
   0xc   :  { %s1654_s24 = scalar_lea.vmem %s38_s14, 1024  ;;  %p1659_p4 = scmp.lt.s32.totalorder %s38_s14, %s38_s14 }
   0xd   :  { %p1655_p3 = scmp.ne.s32.totalorder %s38_s14, %s1654_s24  ;;  %p1660_p5 = scmp.lt.s32.totalorder %s1654_s24, %s1654_s24 }
   0xf   :  { %p1661_p6 = por %p1660_p5, %p1659_p4 }
  0x11   :  { %p1662_p7 = pnand %p1661_p6, %p1655_p3 }
  0x13   :  { %1665 = shalt.err (!%p1662_p7)
}
  0x14   :  { %s1810_s25 = smov 64   ;;  %s1811_s26 = smov 4  }
  0x15   :  { %43 = dma.hbm_to_vmem [thread:$0]  %s2117_s1, 1024, %s38_s14, [#allocation6], %s1810_s25, %s1810_s25, %s1811_s26  }
  0x16   :  { %s1666_s11 = scalar_lea.hbm %s2119_s3, 3072 }
  0x17   :  { %p1667_p8 = scmp.ne.s32.totalorder %s2119_s3, %s1666_s11  ;;  %p1670_p9 = scmp.lt.u32.totalorder %s1666_s11, %s2119_s3 }
  0x19   :  { %p1672_p10 = pnand %p1670_p9, %p1667_p8 }
  0x1b   :  { %1675 = shalt.err (!%p1672_p10)
}
  0x1c   :  { %s1676_s18 = scalar_lea.vmem %s1876_s16, 3072  ;;  %p1681_p12 = scmp.lt.s32.totalorder %s1876_s16, %s1876_s16 }
  0x1d   :  { %p1677_p11 = scmp.ne.s32.totalorder %s1876_s16, %s1676_s18  ;;  %p1682_p13 = scmp.lt.s32.totalorder %s1676_s18, %s1676_s18 }
  0x1f   :  { %p1683_p0 = por %p1682_p13, %p1681_p12 }
  0x21   :  { %p1684_p1 = pnand %p1683_p0, %p1677_p11 }
  0x23   :  { %1687 = shalt.err (!%p1684_p1)
}
  0x24   :  { %67 = dma.hbm_to_vmem [thread:$0]  %s2119_s3, 3072, %s1876_s16, [#allocation9], %s1810_s25, %s1810_s25, %s1811_s26  }
  0x25   :  { %s1812_s19 = smov [#allocation2]   ;;  %s1813_s21 = smov [#allocation7]  }
  0x26   :  { %s25_s20 = sshll.u32 %s1812_s19, 4  ;;  %s49_s22 = sshll.u32 %s1813_s21, 4  ;;  %s26_s20 = int_to_ptr.vmem [resolvable:$true] %s25_s20  ;;  %s1913_s22 = int_to_ptr.vmem [resolvable:$true] %s49_s22 }
  0x27   :  { %s1688_s27 = scalar_lea.hbm %s2116_s0, 128 }
  0x28   :  { %p1689_p2 = scmp.ne.s32.totalorder %s2116_s0, %s1688_s27  ;;  %p1692_p3 = scmp.lt.u32.totalorder %s1688_s27, %s2116_s0 }
  0x2a   :  { %p1694_p4 = pnand %p1692_p3, %p1689_p2 }
  0x2c   :  { %1697 = shalt.err (!%p1694_p4)
}
  0x2d   :  { %s1698_s3 = scalar_lea.vmem %s26_s20, 128  ;;  %p1703_p6 = scmp.lt.s32.totalorder %s26_s20, %s26_s20 }
  0x2e   :  { %p1699_p5 = scmp.ne.s32.totalorder %s26_s20, %s1698_s3  ;;  %p1704_p7 = scmp.lt.s32.totalorder %s1698_s3, %s1698_s3 }
  0x30   :  { %p1705_p8 = por %p1704_p7, %p1703_p6 }
  0x32   :  { %p1706_p9 = pnand %p1705_p8, %p1699_p5 }
  0x34   :  { %1709 = shalt.err (!%p1706_p9)
}
  0x35   :  { %31 = dma.hbm_to_vmem [thread:$0]  %s2116_s0, 128, %s26_s20, [#allocation3], %s1810_s25, %s1810_s25, %s1811_s26  }
  0x36   :  { %s1710_s17 = scalar_lea.hbm %s2118_s2, 2048 }
  0x37   :  { %p1711_p10 = scmp.ne.s32.totalorder %s2118_s2, %s1710_s17  ;;  %p1714_p11 = scmp.lt.u32.totalorder %s1710_s17, %s2118_s2 }
  0x39   :  { %p1716_p12 = pnand %p1714_p11, %p1711_p10 }
  0x3b   :  { %1719 = shalt.err (!%p1716_p12)
}
  0x3c   :  { %s1720_s21 = scalar_lea.vmem %s1913_s22, 2048  ;;  %p1725_p0 = scmp.lt.s32.totalorder %s1913_s22, %s1913_s22 }
  0x3d   :  { %p1721_p13 = scmp.ne.s32.totalorder %s1913_s22, %s1720_s21  ;;  %p1726_p1 = scmp.lt.s32.totalorder %s1720_s21, %s1720_s21 }
  0x3f   :  { %p1727_p2 = por %p1726_p1, %p1725_p0 }
  0x41   :  { %p1728_p3 = pnand %p1727_p2, %p1721_p13 }
  0x43   :  { %1731 = shalt.err (!%p1728_p3)
}
  0x44   :  { %55 = dma.hbm_to_vmem [thread:$0]  %s2118_s2, 2048, %s1913_s22, [#allocation6], %s1810_s25, %s1810_s25, %s1811_s26  }
  0x45   :  { %s1814_s23 = smov [#allocation10]   ;;  %s1815_s27 = smov [#allocation11]  }
  0x46   :  { %s73_s24 = sshll.u32 %s1814_s23, 4  ;;  %s85_s28 = sshll.u32 %s1815_s27, 4  ;;  %s74_s24 = int_to_ptr.vmem [resolvable:$true] %s73_s24  ;;  %s1950_s28 = int_to_ptr.vmem [resolvable:$true] %s85_s28 }
  0x47   :  { %s1732_s11 = scalar_lea.hbm %s2120_s4, 2048 }
  0x48   :  { %p1733_p4 = scmp.ne.s32.totalorder %s2120_s4, %s1732_s11  ;;  %p1736_p5 = scmp.lt.u32.totalorder %s1732_s11, %s2120_s4 }
  0x4a   :  { %p1738_p6 = pnand %p1736_p5, %p1733_p4 }
  0x4c   :  { %1741 = shalt.err (!%p1738_p6)
}
  0x4d   :  { %s1742_s2 = scalar_lea.vmem %s74_s24, 2048  ;;  %p1747_p8 = scmp.lt.s32.totalorder %s74_s24, %s74_s24 }
  0x4e   :  { %p1743_p7 = scmp.ne.s32.totalorder %s74_s24, %s1742_s2  ;;  %p1748_p9 = scmp.lt.s32.totalorder %s1742_s2, %s1742_s2 }
  0x50   :  { %p1749_p10 = por %p1748_p9, %p1747_p8 }
  0x52   :  { %p1750_p11 = pnand %p1749_p10, %p1743_p7 }
  0x54   :  { %1753 = shalt.err (!%p1750_p11)
}
  0x55   :  { %79 = dma.hbm_to_vmem [thread:$0]  %s2120_s4, 2048, %s74_s24, [#allocation9], %s1810_s25, %s1810_s25, %s1811_s26  }
  0x56   :  { %s1754_s1 = scalar_lea.hbm %s2121_s5, 1024 }
  0x57   :  { %p1755_p12 = scmp.ne.s32.totalorder %s2121_s5, %s1754_s1  ;;  %p1758_p13 = scmp.lt.u32.totalorder %s1754_s1, %s2121_s5 }
  0x59   :  { %p1760_p0 = pnand %p1758_p13, %p1755_p12 }
  0x5b   :  { %1763 = shalt.err (!%p1760_p0)
}
  0x5c   :  { %s1764_s20 = scalar_lea.vmem %s1950_s28, 1024  ;;  %p1769_p2 = scmp.lt.s32.totalorder %s1950_s28, %s1950_s28 }
  0x5d   :  { %p1765_p1 = scmp.ne.s32.totalorder %s1950_s28, %s1764_s20  ;;  %p1770_p3 = scmp.lt.s32.totalorder %s1764_s20, %s1764_s20 }
  0x5f   :  { %p1771_p4 = por %p1770_p3, %p1769_p2 }
  0x61   :  { %p1772_p5 = pnand %p1771_p4, %p1765_p1 }
  0x63   :  { %1775 = shalt.err (!%p1772_p5)
}
  0x64   :  { %91 = dma.hbm_to_vmem [thread:$0]  %s2121_s5, 1024, %s1950_s28, [#allocation12], %s1810_s25, %s1810_s25, %s1811_s26  }
  0x65   :  { %1798 = dma.done.wait [#allocation3], 128  }
  0x66   :  { %1799 = vsyncadd [#allocation3], 4294967168 }
  0x67   :  { %1800 = dma.done.wait [#allocation6], 3072  }
  0x68   :  { %1801 = vsyncadd [#allocation6], 4294964224 }
  0x69   :  { %1802 = dma.done.wait [#allocation9], 5120  }
  0x6a   :  { %1803 = vsyncadd [#allocation9], 4294962176 }
  0x6b   :  { %1804 = dma.done.wait [#allocation12], 1024  }
  0x6c   :  { %1805 = vsyncadd [#allocation12], 4294966272  ;;  %v1816_v0 = vmov 0.0   ;;  %vm1817_vm0 = vmmov 0   ;;  %v1547_v1 = vld [vmem:[#allocation5] sm:$0xff]   ;;  %v1548_v2 = vld [vmem:[#allocation5 + $0x8] sm:$0xff]  }
  0x6d   :  { %1354 = vmatprep.subr.bf16.mxu0 %v1816_v0  ;;  %1370 = vmatprep.mubr.msk.bf16.mxu0 %vm1817_vm0, %v1816_v0  ;;  %v1549_v3 = vld [vmem:[#allocation5 + $0x10] sm:$0xff]   ;;  %v1556_v4 = vld [vmem:[#allocation8] sm:$0xff]   ;;  %v1550_v5 = vld [vmem:[#allocation5 + $0x18] sm:$0xff]   ;;  %s1818_s17 = smov [#allocation13]  }
  0x6e   :  { %1374 = vmatprep.subr.bf16.mxu1 %v1816_v0  ;;  %1390 = vmatprep.mubr.msk.bf16.mxu1 %vm1817_vm0, %v1816_v0  ;;  %v1557_v6 = vld [vmem:[#allocation8 + $0x8] sm:$0xff]   ;;  %v1551_v7 = vld [vmem:[#allocation5 + $0x20] sm:$0xff]   ;;  %v1558_v8 = vld [vmem:[#allocation8 + $0x10] sm:$0xff]   ;;  %s1171_s18 = sshll.u32 %s1818_s17, 4  ;;  %s1172_s18 = int_to_ptr.vmem [resolvable:$true] %s1171_s18 }
  0x6f   :  { %1355 = vmatpush3.bf16.msra.mxu0 %v1547_v1  ;;  %1375 = vmatpush3.bf16.msra.mxu1 %v1556_v4  ;;  %v1552_v9 = vld [vmem:[#allocation5 + $0x28] sm:$0xff]   ;;  %v1559_v10 = vld [vmem:[#allocation8 + $0x18] sm:$0xff]   ;;  %v1553_v11 = vld [vmem:[#allocation5 + $0x30] sm:$0xff]   ;;  %p1781_p7 = scmp.lt.s32.totalorder %s1172_s18, %s1172_s18 }
  0x70   :  { %1356 = vmatprep.subr.bf16.mxu0 %v1816_v0  ;;  %1376 = vmatprep.subr.bf16.mxu1 %v1816_v0  ;;  %v1554_v12 = vld [vmem:[#allocation5 + $0x38] sm:$0xff]   ;;  %v1560_v14 = vld [vmem:[#allocation8 + $0x20] sm:$0xff]   ;;  %v1561_v15 = vld [vmem:[#allocation8 + $0x28] sm:$0xff]  }
  0x71   :  { %v1555_v13 = vld [vmem:[#allocation2] sm:$0xff]   ;;  %v1562_v16 = vld [vmem:[#allocation8 + $0x30] sm:$0xff]   ;;  %v1564_v18 = vld [vmem:[#allocation10] sm:$0xff]  }
  0x72   :  { %v1563_v17 = vld [vmem:[#allocation8 + $0x38] sm:$0xff]   ;;  %v1565_v19 = vld [vmem:[#allocation10 + $0x8] sm:$0xff]   ;;  %v1566_v20 = vld [vmem:[#allocation10 + $0x10] sm:$0xff]  }
  0x73   :  { %1357 = vmatpush3.bf16.msra.mxu0 %v1548_v2  ;;  %1377 = vmatpush3.bf16.msra.mxu1 %v1557_v6  ;;  %v1567_v21 = vld [vmem:[#allocation10 + $0x18] sm:$0xff]   ;;  %v1568_v32 = vld [vmem:[#allocation10 + $0x20] sm:$0xff]   ;;  %v1569_v33 = vld [vmem:[#allocation10 + $0x28] sm:$0xff]  }
  0x74   :  { %1358 = vmatprep.subr.bf16.mxu0 %v1816_v0  ;;  %1378 = vmatprep.subr.bf16.mxu1 %v1816_v0  ;;  %v1186_v22 = vld [vmem:[%s2122_s6] ss:$0 sm:$0xff]  ;;  %v1570_v34 = vld [vmem:[#allocation10 + $0x30] sm:$0xff]   ;;  %v1572_v36 = vld [vmem:[#allocation7] sm:$0xff]  }
  0x75   :  { %v1571_v35 = vld [vmem:[#allocation10 + $0x38] sm:$0xff]   ;;  %v1573_v37 = vld [vmem:[#allocation7 + $0x8] sm:$0xff]   ;;  %v1574_v38 = vld [vmem:[#allocation7 + $0x10] sm:$0xff]  }
  0x76   :  { %v1575_v39 = vld [vmem:[#allocation7 + $0x18] sm:$0xff]   ;;  %v1576_v40 = vld [vmem:[#allocation7 + $0x20] sm:$0xff]   ;;  %v1577_v41 = vld [vmem:[#allocation7 + $0x28] sm:$0xff]  }
  0x77   :  { %1359 = vmatpush3.bf16.msra.mxu0 %v1549_v3  ;;  %1379 = vmatpush3.bf16.msra.mxu1 %v1558_v8  ;;  %v1196_v42 = vld [vmem:[%s2123_s7] ss:$0 sm:$0xff]  ;;  %v1578_v52 = vld [vmem:[#allocation7 + $0x30] sm:$0xff]   ;;  %v1580_v54 = vld [vmem:[#allocation8 + $0x40] sm:$0xff]  }
  0x78   :  { %1360 = vmatprep.subr.bf16.mxu0 %v1816_v0  ;;  %1380 = vmatprep.subr.bf16.mxu1 %v1816_v0  ;;  %v1579_v53 = vld [vmem:[#allocation7 + $0x38] sm:$0xff]   ;;  %v1581_v55 = vld [vmem:[#allocation8 + $0x48] sm:$0xff]   ;;  %v1582_v56 = vld [vmem:[#allocation8 + $0x50] sm:$0xff]  }
  0x79   :  { %v1583_v57 = vld [vmem:[#allocation8 + $0x58] sm:$0xff]   ;;  %v1584_v3 = vld [vmem:[#allocation8 + $0x60] sm:$0xff]   ;;  %v1585_v4 = vld [vmem:[#allocation8 + $0x68] sm:$0xff]  }
  0x7a   :  { %v1205_v58 = vld [vmem:[%s2124_s8] ss:$0 sm:$0xff]  ;;  %v1589_v8 = vld [vmem:[#allocation10 + $0x48] sm:$0xff]  }
  0x7b   :  { %1361 = vmatpush3.bf16.msra.mxu0 %v1550_v5  ;;  %1381 = vmatpush3.bf16.msra.mxu1 %v1559_v10  ;;  %v1586_v5 = vld [vmem:[#allocation8 + $0x70] sm:$0xff]   ;;  %v1587_v6 = vld [vmem:[#allocation8 + $0x78] sm:$0xff]  }
  0x7c   :  { %1362 = vmatprep.subr.bf16.mxu0 %v1816_v0  ;;  %1382 = vmatprep.subr.bf16.mxu1 %v1816_v0  ;;  %v1591_v10 = vld [vmem:[#allocation10 + $0x58] sm:$0xff]  }
  0x7f   :  { %1363 = vmatpush3.bf16.msra.mxu0 %v1551_v7  ;;  %1383 = vmatpush3.bf16.msra.mxu1 %v1560_v14  ;;  %v1588_v7 = vld [vmem:[#allocation10 + $0x40] sm:$0xff]  }
  0x80   :  { %1364 = vmatprep.subr.bf16.mxu0 %v1816_v0  ;;  %1384 = vmatprep.subr.bf16.mxu1 %v1816_v0 }
  0x83   :  { %1365 = vmatpush3.bf16.msra.mxu0 %v1552_v9  ;;  %1385 = vmatpush3.bf16.msra.mxu1 %v1561_v15  ;;  %v1590_v9 = vld [vmem:[#allocation10 + $0x50] sm:$0xff]  }
  0x84   :  { %1366 = vmatprep.subr.bf16.mxu0 %v1816_v0  ;;  %1386 = vmatprep.subr.bf16.mxu1 %v1816_v0 }
  0x87   :  { %1367 = vmatpush3.bf16.msra.mxu0 %v1553_v11  ;;  %1387 = vmatpush3.bf16.msra.mxu1 %v1562_v16  ;;  %v1215_v11 = vld [vmem:[%s2122_s6 + $0x1] ss:$0 sm:$0xff] }
  0x88   :  { %1368 = vmatprep.subr.bf16.mxu0 %v1816_v0  ;;  %1388 = vmatprep.subr.bf16.mxu1 %v1816_v0 }
  0x8b   :  { %1369 = vmatpush3.bf16.msra.mxu0 %v1554_v12  ;;  %1389 = vmatpush3.bf16.msra.mxu1 %v1563_v17 }
  0x8c   :  { %1394 = vmatprep.subr.bf16.mxu0 %v1816_v0  ;;  %1414 = vmatprep.subr.bf16.mxu1 %v1816_v0 }
  0x8e   :  { %1371 = vmatmul.mubr.bf16.vlgmr.msra.gmra.mrb[0].mxu0 %v1555_v13 }
  0x8f   :  { %1410 = vmatprep.mubr.msk.bf16.mxu0 %vm1817_vm0, %v1816_v0  ;;  %1395 = vmatpush3.bf16.msra.mxu0 %v1564_v18 }
  0x90   :  { %1396 = vmatprep.subr.bf16.mxu0 %v1816_v0 }
  0x93   :  { %1397 = vmatpush3.bf16.msra.mxu0 %v1565_v19 }
  0x94   :  { %1398 = vmatprep.subr.bf16.mxu0 %v1816_v0 }
  0x97   :  { %1399 = vmatpush3.bf16.msra.mxu0 %v1566_v20 }
  0x98   :  { %1400 = vmatprep.subr.bf16.mxu0 %v1816_v0 }
  0x9b   :  { %1401 = vmatpush3.bf16.msra.mxu0 %v1567_v21  ;;  %v1592_v21 = vld [vmem:[#allocation10 + $0x60] sm:$0xff]  }
  0x9c   :  { %1402 = vmatprep.subr.bf16.mxu0 %v1816_v0 }
  0x9f   :  { %1403 = vmatpush3.bf16.msra.mxu0 %v1568_v32 }
  0xa0   :  { %1404 = vmatprep.subr.bf16.mxu0 %v1816_v0 }
  0xa3   :  { %1405 = vmatpush3.bf16.msra.mxu0 %v1569_v33 }
  0xa4   :  { %1406 = vmatprep.subr.bf16.mxu0 %v1816_v0 }
  0xa7   :  { %1407 = vmatpush3.bf16.msra.mxu0 %v1570_v34 }
  0xa8   :  { %1408 = vmatprep.subr.bf16.mxu0 %v1816_v0 }
  0xab   :  { %1409 = vmatpush3.bf16.msra.mxu0 %v1571_v35 }
  0xac   :  { %1434 = vmatprep.subr.bf16.mxu0 %v1816_v0 }
 0x161   :  { %v232_v23 = vpop.f32.mrb[0].mxu0 }
 0x162   :  { %v233_v24 = vadd.f32 %v1186_v22, %v232_v23  ;;  %v1372_v25 = vpop.f32.mrb[1].mxu0  ;;  %v1594_v23 = vld [vmem:[#allocation10 + $0x70] sm:$0xff]  }
 0x163   :  { %v235_v26 = vpop.f32.mrb[2].mxu0  ;;  %v1596_v25 = vld [vmem:[#allocation7 + $0x40] sm:$0xff]  }
 0x164   :  { %v236_v27 = vadd.f32 %v1186_v22, %v235_v26  ;;  %v1373_v28 = vpop.f32.mrb[3].mxu0  ;;  %1620 = vtanh.f32 %v233_v24  ;;  %v1593_v22 = vld [vmem:[#allocation10 + $0x68] sm:$0xff]   ;;  %v1595_v24 = vld [vmem:[#allocation10 + $0x78] sm:$0xff]  }
 0x165   :  { %v1597_v26 = vld [vmem:[#allocation7 + $0x48] sm:$0xff]   ;;  %v1599_v28 = vld [vmem:[#allocation7 + $0x58] sm:$0xff]  }
 0x166   :  { %1622 = vtanh.f32 %v236_v27  ;;  %v1598_v27 = vld [vmem:[#allocation7 + $0x50] sm:$0xff]  }
 0x16e   :  { %v1621_v29 = vpop.eup %1620 }
 0x170   :  { %v1623_v30 = vpop.eup %1622 }
 0x171   :  { %v241_v31 = vpack.c.bf16 %v1623_v30, %v1621_v29  ;;  %v1600_v29 = vld [vmem:[#allocation7 + $0x60] sm:$0xff]   ;;  %v1601_v30 = vld [vmem:[#allocation7 + $0x68] sm:$0xff]  }
 0x173   :  { %1391 = vmatmul.mubr.bf16.vlgmr.msra.gmra.mrb[0].mxu1 %v241_v31  ;;  %v1225_v31 = vld [vmem:[%s2123_s7 + $0x1] ss:$0 sm:$0xff] }
 0x174   :  { %1430 = vmatprep.mubr.msk.bf16.mxu1 %vm1817_vm0, %v1816_v0  ;;  %1415 = vmatpush3.bf16.msra.mxu1 %v1572_v36 }
 0x175   :  { %1416 = vmatprep.subr.bf16.mxu1 %v1816_v0 }
 0x178   :  { %1417 = vmatpush3.bf16.msra.mxu1 %v1573_v37 }
 0x179   :  { %1418 = vmatprep.subr.bf16.mxu1 %v1816_v0 }
 0x17c   :  { %1419 = vmatpush3.bf16.msra.mxu1 %v1574_v38 }
 0x17d   :  { %1420 = vmatprep.subr.bf16.mxu1 %v1816_v0 }
 0x180   :  { %1421 = vmatpush3.bf16.msra.mxu1 %v1575_v39 }
 0x181   :  { %1422 = vmatprep.subr.bf16.mxu1 %v1816_v0 }
 0x184   :  { %1423 = vmatpush3.bf16.msra.mxu1 %v1576_v40 }
 0x185   :  { %1424 = vmatprep.subr.bf16.mxu1 %v1816_v0 }
 0x188   :  { %1425 = vmatpush3.bf16.msra.mxu1 %v1577_v41  ;;  %v1602_v41 = vld [vmem:[#allocation7 + $0x70] sm:$0xff]  }
 0x189   :  { %1426 = vmatprep.subr.bf16.mxu1 %v1816_v0 }
 0x18c   :  { %1427 = vmatpush3.bf16.msra.mxu1 %v1578_v52 }
 0x18d   :  { %1428 = vmatprep.subr.bf16.mxu1 %v1816_v0 }
 0x190   :  { %1429 = vmatpush3.bf16.msra.mxu1 %v1579_v53 }
 0x191   :  { %1454 = vmatprep.subr.bf16.mxu1 %v1816_v0 }
 0x246   :  { %v347_v43 = vpop.f32.mrb[0].mxu1 }
 0x247   :  { %v348_v44 = vadd.f32 %v1196_v42, %v347_v43  ;;  %v1392_v45 = vpop.f32.mrb[1].mxu1  ;;  %v1604_v43 = vld [vmem:[#allocation8 + $0x80] sm:$0xff]  }
 0x248   :  { %v350_v46 = vpop.f32.mrb[2].mxu1  ;;  %v1606_v45 = vld [vmem:[#allocation8 + $0x90] sm:$0xff]  }
 0x249   :  { %v351_v47 = vadd.f32 %v1196_v42, %v350_v46  ;;  %v1393_v48 = vpop.f32.mrb[3].mxu1  ;;  %1624 = vtanh.f32 %v348_v44  ;;  %v1603_v42 = vld [vmem:[#allocation7 + $0x78] sm:$0xff]   ;;  %v1605_v44 = vld [vmem:[#allocation8 + $0x88] sm:$0xff]  }
 0x24a   :  { %v1607_v46 = vld [vmem:[#allocation8 + $0x98] sm:$0xff]  }
 0x24b   :  { %1626 = vtanh.f32 %v351_v47  ;;  %v1235_v47 = vld [vmem:[%s2124_s8 + $0x1] ss:$0 sm:$0xff] }
 0x253   :  { %v1625_v49 = vpop.eup %1624 }
 0x255   :  { %v1627_v50 = vpop.eup %1626 }
 0x256   :  { %v356_v51 = vpack.c.bf16 %v1627_v50, %v1625_v49 }
 0x258   :  { %1411 = vmatmul.mubr.bf16.vlgmr.msra.gmra.mrb[4].mxu0 %v356_v51 }
 0x259   :  { %1450 = vmatprep.mubr.msk.bf16.mxu0 %vm1817_vm0, %v1816_v0  ;;  %1435 = vmatpush3.bf16.msra.mxu0 %v1580_v54 }
 0x25a   :  { %1436 = vmatprep.subr.bf16.mxu0 %v1816_v0 }
 0x25d   :  { %1437 = vmatpush3.bf16.msra.mxu0 %v1581_v55  ;;  %v1608_v55 = vld [vmem:[#allocation8 + $0xa0] sm:$0xff]  }
 0x25e   :  { %1438 = vmatprep.subr.bf16.mxu0 %v1816_v0 }
 0x261   :  { %1439 = vmatpush3.bf16.msra.mxu0 %v1582_v56  ;;  %v1609_v56 = vld [vmem:[#allocation8 + $0xa8] sm:$0xff]  }
 0x262   :  { %1440 = vmatprep.subr.bf16.mxu0 %v1816_v0 }
 0x265   :  { %1441 = vmatpush3.bf16.msra.mxu0 %v1583_v57  ;;  %v1610_v57 = vld [vmem:[#allocation8 + $0xb0] sm:$0xff]  }
 0x266   :  { %1442 = vmatprep.subr.bf16.mxu0 %v1816_v0 }
 0x269   :  { %1443 = vmatpush3.bf16.msra.mxu0 %v1584_v3 }
 0x26a   :  { %1444 = vmatprep.subr.bf16.mxu0 %v1816_v0 }
 0x26d   :  { %1445 = vmatpush3.bf16.msra.mxu0 %v1585_v4 }
 0x26e   :  { %1446 = vmatprep.subr.bf16.mxu0 %v1816_v0 }
 0x271   :  { %1447 = vmatpush3.bf16.msra.mxu0 %v1586_v5 }
 0x272   :  { %1448 = vmatprep.subr.bf16.mxu0 %v1816_v0 }
 0x275   :  { %1449 = vmatpush3.bf16.msra.mxu0 %v1587_v6 }
 0x276   :  { %1474 = vmatprep.subr.bf16.mxu0 %v1816_v0 }
 0x32b   :  { %v462_v59 = vpop.f32.mrb[4].mxu0 }
 0x32c   :  { %v1412_v60 = vpop.f32.mrb[5].mxu0  ;;  %v463_v62 = vadd.f32 %v1205_v58, %v462_v59  ;;  %v1612_v59 = vld [vmem:[#allocation11] sm:$0xff]  }
 0x32d   :  { %v465_v61 = vpop.f32.mrb[6].mxu0  ;;  %v1613_v60 = vld [vmem:[#allocation11 + $0x8] sm:$0xff]  }
 0x32e   :  { %v466_v63 = vadd.f32 %v1205_v58, %v465_v61  ;;  %v1413_v1 = vpop.f32.mrb[7].mxu0  ;;  %v1611_v58 = vld [vmem:[#allocation8 + $0xb8] sm:$0xff]   ;;  %v1614_v61 = vld [vmem:[#allocation11 + $0x10] sm:$0xff]  }
 0x330   :  { %v469_v2 = vpack.c.bf16 %v466_v63, %v463_v62  ;;  %v1615_v62 = vld [vmem:[#allocation11 + $0x18] sm:$0xff]  }
 0x331   :  { %v1245_v63 = vld [vmem:[%s2122_s6 + $0x2] ss:$0 sm:$0xff] }
 0x332   :  { %1431 = vmatmul.mubr.bf16.vlgmr.msra.gmra.mrb[4].mxu1 %v469_v2 }
 0x333   :  { %1470 = vmatprep.mubr.msk.bf16.mxu1 %vm1817_vm0, %v1816_v0  ;;  %1455 = vmatpush3.bf16.msra.mxu1 %v1588_v7 }
 0x334   :  { %1456 = vmatprep.subr.bf16.mxu1 %v1816_v0 }
 0x337   :  { %1457 = vmatpush3.bf16.msra.mxu1 %v1589_v8 }
 0x338   :  { %1458 = vmatprep.subr.bf16.mxu1 %v1816_v0 }
 0x33b   :  { %1459 = vmatpush3.bf16.msra.mxu1 %v1590_v9 }
 0x33c   :  { %1460 = vmatprep.subr.bf16.mxu1 %v1816_v0 }
 0x33f   :  { %1461 = vmatpush3.bf16.msra.mxu1 %v1591_v10  ;;  %v1616_v10 = vld [vmem:[#allocation11 + $0x20] sm:$0xff]  }
 0x340   :  { %1462 = vmatprep.subr.bf16.mxu1 %v1816_v0 }
 0x343   :  { %1463 = vmatpush3.bf16.msra.mxu1 %v1592_v21 }
 0x344   :  { %1464 = vmatprep.subr.bf16.mxu1 %v1816_v0 }
 0x347   :  { %1465 = vmatpush3.bf16.msra.mxu1 %v1593_v22 }
 0x348   :  { %1466 = vmatprep.subr.bf16.mxu1 %v1816_v0 }
 0x34b   :  { %1467 = vmatpush3.bf16.msra.mxu1 %v1594_v23 }
 0x34c   :  { %1468 = vmatprep.subr.bf16.mxu1 %v1816_v0 }
 0x34f   :  { %1469 = vmatpush3.bf16.msra.mxu1 %v1595_v24 }
 0x350   :  { %1494 = vmatprep.subr.bf16.mxu1 %v1816_v0 }
 0x405   :  { %v576_v12 = vpop.f32.mrb[4].mxu1 }
 0x406   :  { %v577_v13 = vadd.f32 %v1215_v11, %v576_v12  ;;  %v1432_v14 = vpop.f32.mrb[5].mxu1  ;;  %v1618_v12 = vld [vmem:[#allocation11 + $0x30] sm:$0xff]  }
 0x407   :  { %v579_v15 = vpop.f32.mrb[6].mxu1  ;;  %v1255_v14 = vld [vmem:[%s2123_s7 + $0x2] ss:$0 sm:$0xff]  ;;  %s1776_s7 = scalar_lea.vmem %s1172_s18, 256 }
 0x408   :  { %v580_v16 = vadd.f32 %v1215_v11, %v579_v15  ;;  %v1433_v17 = vpop.f32.mrb[7].mxu1  ;;  %1628 = vtanh.f32 %v577_v13  ;;  %v1617_v11 = vld [vmem:[#allocation11 + $0x28] sm:$0xff]   ;;  %v1619_v13 = vld [vmem:[#allocation11 + $0x38] sm:$0xff]   ;;  %p1777_p6 = scmp.ne.s32.totalorder %s1172_s18, %s1776_s7  ;;  %p1782_p8 = scmp.lt.s32.totalorder %s1776_s7, %s1776_s7 }
 0x40a   :  { %1630 = vtanh.f32 %v580_v16  ;;  %p1783_p9 = por %p1782_p8, %p1781_p7 }
 0x40c   :  { %p1784_p10 = pnand %p1783_p9, %p1777_p6 }
 0x412   :  { %v1629_v18 = vpop.eup %1628 }
 0x414   :  { %v1631_v19 = vpop.eup %1630 }
 0x415   :  { %v585_v20 = vpack.c.bf16 %v1631_v19, %v1629_v18 }
 0x417   :  { %1451 = vmatmul.mubr.bf16.vlgmr.msra.gmra.mrb[8].mxu0 %v585_v20 }
 0x418   :  { %1490 = vmatprep.mubr.msk.bf16.mxu0 %vm1817_vm0, %v1816_v0  ;;  %1475 = vmatpush3.bf16.msra.mxu0 %v1596_v25 }
 0x419   :  { %1476 = vmatprep.subr.bf16.mxu0 %v1816_v0 }
 0x41c   :  { %1477 = vmatpush3.bf16.msra.mxu0 %v1597_v26 }
 0x41d   :  { %1478 = vmatprep.subr.bf16.mxu0 %v1816_v0 }
 0x420   :  { %1479 = vmatpush3.bf16.msra.mxu0 %v1598_v27 }
 0x421   :  { %1480 = vmatprep.subr.bf16.mxu0 %v1816_v0 }
 0x424   :  { %1481 = vmatpush3.bf16.msra.mxu0 %v1599_v28 }
 0x425   :  { %1482 = vmatprep.subr.bf16.mxu0 %v1816_v0 }
 0x428   :  { %1483 = vmatpush3.bf16.msra.mxu0 %v1600_v29 }
 0x429   :  { %1484 = vmatprep.subr.bf16.mxu0 %v1816_v0 }
 0x42c   :  { %1485 = vmatpush3.bf16.msra.mxu0 %v1601_v30 }
 0x42d   :  { %1486 = vmatprep.subr.bf16.mxu0 %v1816_v0 }
 0x430   :  { %1487 = vmatpush3.bf16.msra.mxu0 %v1602_v41 }
 0x431   :  { %1488 = vmatprep.subr.bf16.mxu0 %v1816_v0 }
 0x434   :  { %1489 = vmatpush3.bf16.msra.mxu0 %v1603_v42 }
 0x435   :  { %1514 = vmatprep.subr.bf16.mxu0 %v1816_v0 }
 0x4ea   :  { %v693_v32 = vpop.f32.mrb[8].mxu0 }
 0x4eb   :  { %v694_v33 = vadd.f32 %v1225_v31, %v693_v32  ;;  %v1452_v34 = vpop.f32.mrb[9].mxu0 }
 0x4ec   :  { %v696_v35 = vpop.f32.mrb[10].mxu0 }
 0x4ed   :  { %v697_v36 = vadd.f32 %v1225_v31, %v696_v35  ;;  %v1453_v37 = vpop.f32.mrb[11].mxu0  ;;  %1632 = vtanh.f32 %v694_v33 }
 0x4ef   :  { %1634 = vtanh.f32 %v697_v36 }
 0x4f7   :  { %v1633_v38 = vpop.eup %1632 }
 0x4f9   :  { %v1635_v39 = vpop.eup %1634 }
 0x4fa   :  { %v702_v40 = vpack.c.bf16 %v1635_v39, %v1633_v38 }
 0x4fc   :  { %1471 = vmatmul.mubr.bf16.vlgmr.msra.gmra.mrb[8].mxu1 %v702_v40 }
 0x4fd   :  { %1510 = vmatprep.mubr.msk.bf16.mxu1 %vm1817_vm0, %v1816_v0  ;;  %1495 = vmatpush3.bf16.msra.mxu1 %v1604_v43 }
 0x4fe   :  { %1496 = vmatprep.subr.bf16.mxu1 %v1816_v0 }
 0x501   :  { %1497 = vmatpush3.bf16.msra.mxu1 %v1605_v44 }
 0x502   :  { %1498 = vmatprep.subr.bf16.mxu1 %v1816_v0 }
 0x505   :  { %1499 = vmatpush3.bf16.msra.mxu1 %v1606_v45 }
 0x506   :  { %1500 = vmatprep.subr.bf16.mxu1 %v1816_v0 }
 0x509   :  { %1501 = vmatpush3.bf16.msra.mxu1 %v1607_v46 }
 0x50a   :  { %1502 = vmatprep.subr.bf16.mxu1 %v1816_v0 }
 0x50d   :  { %1503 = vmatpush3.bf16.msra.mxu1 %v1608_v55 }
 0x50e   :  { %1504 = vmatprep.subr.bf16.mxu1 %v1816_v0 }
 0x511   :  { %1505 = vmatpush3.bf16.msra.mxu1 %v1609_v56 }
 0x512   :  { %1506 = vmatprep.subr.bf16.mxu1 %v1816_v0 }
 0x515   :  { %1507 = vmatpush3.bf16.msra.mxu1 %v1610_v57 }
 0x516   :  { %1508 = vmatprep.subr.bf16.mxu1 %v1816_v0 }
 0x519   :  { %1509 = vmatpush3.bf16.msra.mxu1 %v1611_v58 }
 0x5cf   :  { %v810_v48 = vpop.f32.mrb[8].mxu1 }
 0x5d0   :  { %v1472_v49 = vpop.f32.mrb[9].mxu1  ;;  %v811_v51 = vadd.f32 %v1235_v47, %v810_v48 }
 0x5d1   :  { %v813_v50 = vpop.f32.mrb[10].mxu1 }
 0x5d2   :  { %v814_v52 = vadd.f32 %v1235_v47, %v813_v50  ;;  %v1473_v53 = vpop.f32.mrb[11].mxu1 }
 0x5d4   :  { %v817_v54 = vpack.c.bf16 %v814_v52, %v811_v51 }
 0x5d6   :  { %1491 = vmatmul.mubr.bf16.vlgmr.msra.gmra.mrb[12].mxu0 %v817_v54 }
 0x5d7   :  { %1530 = vmatprep.mubr.msk.bf16.mxu0 %vm1817_vm0, %v1816_v0  ;;  %1515 = vmatpush3.bf16.msra.mxu0 %v1612_v59 }
 0x5d8   :  { %1516 = vmatprep.subr.bf16.mxu0 %v1816_v0 }
 0x5db   :  { %1517 = vmatpush3.bf16.msra.mxu0 %v1613_v60 }
 0x5dc   :  { %1518 = vmatprep.subr.bf16.mxu0 %v1816_v0 }
 0x5df   :  { %1519 = vmatpush3.bf16.msra.mxu0 %v1614_v61 }
 0x5e0   :  { %1520 = vmatprep.subr.bf16.mxu0 %v1816_v0 }
 0x5e3   :  { %1521 = vmatpush3.bf16.msra.mxu0 %v1615_v62 }
 0x5e4   :  { %1522 = vmatprep.subr.bf16.mxu0 %v1816_v0 }
 0x5e7   :  { %1523 = vmatpush3.bf16.msra.mxu0 %v1616_v10 }
 0x5e8   :  { %1524 = vmatprep.subr.bf16.mxu0 %v1816_v0 }
 0x5eb   :  { %1525 = vmatpush3.bf16.msra.mxu0 %v1617_v11 }
 0x5ec   :  { %1526 = vmatprep.subr.bf16.mxu0 %v1816_v0 }
 0x5ef   :  { %1527 = vmatpush3.bf16.msra.mxu0 %v1618_v12 }
 0x5f0   :  { %1528 = vmatprep.subr.bf16.mxu0 %v1816_v0  ;;  %v1264_v0 = vld [vmem:[%s2125_s9] ss:$0 sm:$0xff] }
 0x5f3   :  { %1529 = vmatpush3.bf16.msra.mxu0 %v1619_v13 }
 0x6a9   :  { %v925_v1 = vpop.f32.mrb[12].mxu0 }
 0x6aa   :  { %v926_v2 = vadd.f32 %v1245_v63, %v925_v1  ;;  %v1492_v3 = vpop.f32.mrb[13].mxu0 }
 0x6ab   :  { %v928_v4 = vpop.f32.mrb[14].mxu0 }
 0x6ac   :  { %v929_v5 = vadd.f32 %v1245_v63, %v928_v4  ;;  %v1493_v6 = vpop.f32.mrb[15].mxu0  ;;  %1636 = vtanh.f32 %v926_v2 }
 0x6ae   :  { %1638 = vtanh.f32 %v929_v5 }
 0x6b6   :  { %v1637_v7 = vpop.eup %1636 }
 0x6b8   :  { %v1639_v8 = vpop.eup %1638 }
 0x6b9   :  { %v934_v9 = vpack.c.bf16 %v1639_v8, %v1637_v7 }
 0x6bb   :  { %1511 = vmatmul.mubr.bf16.vlgmr.msra.gmra.mrb[12].mxu1 %v934_v9 }
 0x78e   :  { %v1042_v15 = vpop.f32.mrb[12].mxu1 }
 0x78f   :  { %v1043_v16 = vadd.f32 %v1255_v14, %v1042_v15  ;;  %v1512_v17 = vpop.f32.mrb[13].mxu1 }
 0x790   :  { %v1045_v18 = vpop.f32.mrb[14].mxu1 }
 0x791   :  { %v1046_v19 = vadd.f32 %v1255_v14, %v1045_v18  ;;  %v1513_v20 = vpop.f32.mrb[15].mxu1  ;;  %1640 = vtanh.f32 %v1043_v16 }
 0x793   :  { %1642 = vtanh.f32 %v1046_v19 }
 0x79b   :  { %v1641_v21 = vpop.eup %1640 }
 0x79d   :  { %v1643_v22 = vpop.eup %1642 }
 0x79e   :  { %v1051_v23 = vpack.c.bf16 %v1643_v22, %v1641_v21 }
 0x7a0   :  { %1531 = vmatmul.mubr.bf16.vlgmr.msra.gmra.mrb[16].mxu0 %v1051_v23 }
 0x873   :  { %v1157_v24 = vpop.f32.mrb[16].mxu0 }
 0x874   :  { %v1158_v25 = vadd.f32 %v1264_v0, %v1157_v24  ;;  %v1532_v26 = vpop.f32.mrb[17].mxu0 }
 0x875   :  { %v1160_v27 = vpop.f32.mrb[18].mxu0 }
 0x876   :  { %1164 = vst [vmem:[#allocation13] sm:$0xff] %v1158_v25  ;;  %v1161_v28 = vadd.f32 %v1264_v0, %v1160_v27  ;;  %v1533_v29 = vpop.f32.mrb[19].mxu0 }
 0x878   :  { %1165 = vst [vmem:[#allocation13 + $0x8] sm:$0xff] %v1161_v28 }
 0x879   :  { %1787 = shalt.err (!%p1784_p10)
}
 0x87a   :  { %s1788_s14 = scalar_lea.hbm %s2126_s10, 256 }
 0x87b   :  { %p1789_p11 = scmp.ne.s32.totalorder %s2126_s10, %s1788_s14  ;;  %p1792_p12 = scmp.lt.u32.totalorder %s1788_s14, %s2126_s10 }
 0x87d   :  { %p1794_p13 = pnand %p1792_p12, %p1789_p11 }
 0x87f   :  { %1797 = shalt.err (!%p1794_p13)
}
 0x880   :  { %s1819_s4 = smov 128   ;;  %s1820_s23 = smov 8  }
 0x881   :  { %1177 = dma.vmem_to_hbm [thread:$0]  %s1172_s18, 256, %s2126_s10, [#allocation4], %s1819_s4, %s1819_s4, %s1820_s23  }
 0x882   :  { %1806 = dma.done.wait [#allocation4], 256  }
 0x883   :  { %1807 = vsyncadd [#allocation4], 4294967040 }
 0x884   :  { %1181 = vsyncpa [#allocation3], 1 }
 0x885   :  { %1182 = vsyncpa [#allocation6], 1 }
 0x886   :  { %1183 = vsyncpa [#allocation9], 1 }
 0x887   :  { %1184 = vsyncpa [#allocation12], 1 }
 0x888   :  { %1185 = vsyncpa [#allocation4], 1 }

</bundles_post_ra>
